<compile_context>
chip_gen: v5e
topology: v5e:2x2
jax: 0.10.0
libtpu: 0.0.40
codegen_flags: <defaults>
</compile_context>

<pallas_src>
import functools
import math

import jax
import jax.numpy as jnp
from jax import lax
from jax.experimental import pallas as pl
from jax.experimental.pallas import tpu as pltpu

LN_EPS = 1e-5        # F.layer_norm default eps
L2_EPS_SQ = 1e-24    # (F.normalize eps)^2, applied on the squared norm


# --------------------------------------------------------------------------
# Kernel 1: fused LayerNorm + QKV projection   y = LN(x) @ [w_q | w_kv]
# --------------------------------------------------------------------------
def _ln_qkv_kernel(x_ref, g_ref, b_ref, w_ref, o_ref, xn_scr):
    # x_ref: (tm, K); g/b: (1, K); w_ref: (K, tn); o_ref: (tm, tn)
    # LN is computed once per row-tile (j == 0) into a bf16 VMEM scratch and
    # re-used for every output-column tile (j axis is "arbitrary").
    @pl.when(pl.program_id(1) == 0)
    def _():
        x = x_ref[...].astype(jnp.float32)
        mean = jnp.mean(x, axis=-1, keepdims=True)
        xc = x - mean
        var = jnp.mean(xc * xc, axis=-1, keepdims=True)      # centered two-pass
        xn = xc * lax.rsqrt(var + LN_EPS)
        xn = xn * g_ref[...].astype(jnp.float32) + b_ref[...].astype(jnp.float32)
        xn_scr[...] = xn.astype(xn_scr.dtype)                # bf16 MXU operand

    o_ref[...] = jnp.dot(
        xn_scr[...], w_ref[...].astype(jnp.bfloat16),
        preferred_element_type=jnp.float32,
    ).astype(o_ref.dtype)


def ln_qkv_proj(x2, gamma, beta, w, *, tm_max=256, tn_max=512):
    """x2: (M, K); w: (K, N).  Returns LN(x2) @ w, shape (M, N)."""
    M, K = x2.shape
    N = w.shape[-1]
    g2 = gamma.reshape(1, K)
    b2 = beta.reshape(1, K)

    tm = M if M <= tm_max else tm_max      # tm_max multiple of 8
    tn = N if N <= tn_max else tn_max      # tn_max multiple of 128
    grid = (pl.cdiv(M, tm), pl.cdiv(N, tn))

    # TODO(synk): for very large model dims a K-tiled LN-stats path (mean/var
    # accumulated across K tiles) would be needed to bound the (tm, K) block.
    return pl.pallas_call(
        _ln_qkv_kernel,
        out_shape=jax.ShapeDtypeStruct((M, N), x2.dtype),
        grid_spec=pltpu.PrefetchScalarGridSpec(
            num_scalar_prefetch=0,
            grid=grid,
            in_specs=[
                pl.BlockSpec((tm, K), lambda i, j: (i, 0)),
                pl.BlockSpec((1, K), lambda i, j: (0, 0)),   # gamma: loaded once
                pl.BlockSpec((1, K), lambda i, j: (0, 0)),   # beta : loaded once
                pl.BlockSpec((K, tn), lambda i, j: (0, j)),
            ],
            out_specs=pl.BlockSpec((tm, tn), lambda i, j: (i, j)),
            scratch_shapes=[pltpu.VMEM((tm, K), jnp.bfloat16)],
        ),
        compiler_params=pltpu.CompilerParams(
            # j must be "arbitrary": tiles j>0 reuse the LN scratch written at j==0.
            dimension_semantics=("parallel", "arbitrary"),
            vmem_limit_bytes=32 * 1024 * 1024,   # safe on v5e/v6e/v7x
        ),
    )(x2, g2, b2, w)


# --------------------------------------------------------------------------
# Kernel 2: generic bias-free linear with K-tiled f32 accumulator
# --------------------------------------------------------------------------
def _matmul_kernel(x_ref, w_ref, o_ref, acc_ref):
    @pl.when(pl.program_id(2) == 0)
    def _():
        acc_ref[...] = jnp.zeros_like(acc_ref)

    acc_ref[...] += jnp.dot(
        x_ref[...].astype(jnp.bfloat16), w_ref[...].astype(jnp.bfloat16),
        preferred_element_type=jnp.float32,
    )

    @pl.when(pl.program_id(2) == pl.num_programs(2) - 1)
    def _():
        o_ref[...] = acc_ref[...].astype(o_ref.dtype)


def linear(x, w, *, tm_max=256, tn_max=512, tk_max=1024):
    """x: (..., K) @ w: (K, N) -> (..., N). nn.Linear(bias=False), weight = w.T."""
    orig_shape = x.shape
    K = orig_shape[-1]
    M = math.prod(orig_shape[:-1])
    N = w.shape[-1]
    x2 = x.reshape(M, K)

    tm = M if M <= tm_max else tm_max
    tn = N if N <= tn_max else tn_max
    tk = K if K <= tk_max else tk_max
    if K % tk != 0:
        tk = K   # TODO(synk): pad the contraction dim instead of the full-K fallback
    grid = (pl.cdiv(M, tm), pl.cdiv(N, tn), K // tk)

    out = pl.pallas_call(
        _matmul_kernel,
        out_shape=jax.ShapeDtypeStruct((M, N), x.dtype),
        grid_spec=pltpu.PrefetchScalarGridSpec(
            num_scalar_prefetch=0,
            grid=grid,
            in_specs=[
                pl.BlockSpec((tm, tk), lambda i, j, k: (i, k)),
                pl.BlockSpec((tk, tn), lambda i, j, k: (k, j)),
            ],
            out_specs=pl.BlockSpec((tm, tn), lambda i, j, k: (i, j)),
            scratch_shapes=[pltpu.VMEM((tm, tn), jnp.float32)],
        ),
        compiler_params=pltpu.CompilerParams(
            dimension_semantics=("parallel", "parallel", "arbitrary"),
            vmem_limit_bytes=32 * 1024 * 1024,
        ),
    )(x2, w)
    return out.reshape(*orig_shape[:-1], N)


# --------------------------------------------------------------------------
# Kernel 3: fused cosine-sim attention (null-kv folded, head-pair lane-dense)
# --------------------------------------------------------------------------
def _attn_kernel(q_ref, k_ref, v_ref, nk_ref, nv_ref, qs_ref, ks_ref,
                 o_ref, kn_scr, *, scale, hpb, dim_head):
    # q_ref:  (1, tq, hpb*D)   k_ref/v_ref: (1, Nk, hpb*D)
    # nk/nv:  (1, hpb*D)       qs/ks: (1, D)      o_ref: (1, tq, hpb*D)
    D = dim_head
    ks = ks_ref[...].astype(jnp.float32)                 # (1, D)
    qs = qs_ref[...].astype(jnp.float32) * scale         # scale folded into q

    # Hoist: l2norm + k_scale on K computed once per (batch, head-pair) and
    # cached (already in bf16) across all query tiles (qi axis is "arbitrary").
    @pl.when(pl.program_id(2) == 0)
    def _():
        k = k_ref[0].astype(jnp.float32)                  # (Nk, hpb*D)
        for hh in range(hpb):
            sl = slice(hh * D, (hh + 1) * D)
            kh = k[:, sl]
            kh = kh * lax.rsqrt(jnp.maximum(
                jnp.sum(kh * kh, axis=-1, keepdims=True), L2_EPS_SQ))
            kn_scr[:, sl] = (kh * ks).astype(kn_scr.dtype)

    q = q_ref[0].astype(jnp.float32)                      # (tq, hpb*D)
    outs = []
    for hh in range(hpb):                                 # unrolled at trace time
        sl = slice(hh * D, (hh + 1) * D)

        qh = q[:, sl]
        qh = qh * lax.rsqrt(jnp.maximum(
            jnp.sum(qh * qh, axis=-1, keepdims=True), L2_EPS_SQ))
        qh = qh * qs                                      # q_scale * scale

        # learned null key/value for this head (folded, Nk stays = N)
        nk = nk_ref[:, sl].astype(jnp.float32)            # (1, D)
        nk = nk * lax.rsqrt(jnp.maximum(
            jnp.sum(nk * nk, axis=-1, keepdims=True), L2_EPS_SQ)) * ks
        nv = nv_ref[:, sl].astype(jnp.float32)            # (1, D)

        sim = lax.dot_general(                            # (tq, Nk), bf16 MXU
            qh.astype(jnp.bfloat16), kn_scr[:, sl],
            dimension_numbers=(((1,), (1,)), ((), ())),
            preferred_element_type=jnp.float32)
        sim_null = jnp.sum(qh * nk, axis=-1, keepdims=True)   # (tq, 1), VPU+XLU

        m = jnp.maximum(jnp.max(sim, axis=-1, keepdims=True), sim_null)
        p = jnp.exp(sim - m)
        p_null = jnp.exp(sim_null - m)
        inv = pl.reciprocal(jnp.sum(p, axis=-1, keepdims=True) + p_null,
                            approx=True)

        pv = jnp.dot(p.astype(jnp.bfloat16),
                     v_ref[0, :, sl].astype(jnp.bfloat16),
                     preferred_element_type=jnp.float32)   # (tq, D)
        outs.append((pv + p_null * nv) * inv)

    # one 128-wide lane-dense store, already in merged (b n (h d)) layout
    o_ref[0] = jnp.concatenate(outs, axis=-1).astype(o_ref.dtype)


def fused_attention(qkv, null_k, null_v, q_scale, k_scale, *,
                    heads, dim_head, scale, tq_max=256):
    """qkv: (B, N, 3*H*D) packed [q | k | v]; null_k/null_v: (1, H*D);
    q_scale/k_scale: (D,).  Returns (B, N, H*D) merged-head output."""
    B, N, three_inner = qkv.shape
    H, D = heads, dim_head
    inner = H * D
    assert three_inner == 3 * inner

    # Heads per block so the last block dim is a multiple of 128 (lane-dense).
    if D % 128 == 0:
        hpb = 1
    else:
        hpb = 128 // D
        assert 128 % D == 0 and H % hpb == 0, (
            "TODO(synk): dim_head/heads combos not packing to 128 lanes")
    HP = H // hpb
    Nk = N
    tq = N if N <= tq_max else tq_max
    grid = (B, HP, pl.cdiv(N, tq))

    qs2 = q_scale.reshape(1, D)
    ks2 = k_scale.reshape(1, D)

    # TODO(synk): for very long kv sequences switch to an online-softmax
    # (flash-style) kv loop; a full-Nk block is fine at these sizes.
    kernel = functools.partial(_attn_kernel, scale=scale, hpb=hpb, dim_head=D)
    return pl.pallas_call(
        kernel,
        out_shape=jax.ShapeDtypeStruct((B, N, inner), qkv.dtype),
        grid_spec=pltpu.PrefetchScalarGridSpec(
            num_scalar_prefetch=0,
            grid=grid,
            in_specs=[
                # q / k / v are all views into the packed qkv projection output
                pl.BlockSpec((1, tq, hpb * D), lambda b, hp, qi: (b, qi, hp)),
                pl.BlockSpec((1, Nk, hpb * D), lambda b, hp, qi: (b, 0, HP + hp)),
                pl.BlockSpec((1, Nk, hpb * D), lambda b, hp, qi: (b, 0, 2 * HP + hp)),
                pl.BlockSpec((1, hpb * D), lambda b, hp, qi: (0, hp)),   # null k
                pl.BlockSpec((1, hpb * D), lambda b, hp, qi: (0, hp)),   # null v
                pl.BlockSpec((1, D), lambda b, hp, qi: (0, 0)),          # q_scale
                pl.BlockSpec((1, D), lambda b, hp, qi: (0, 0)),          # k_scale
            ],
            out_specs=pl.BlockSpec((1, tq, hpb * D), lambda b, hp, qi: (b, qi, hp)),
            scratch_shapes=[pltpu.VMEM((Nk, hpb * D), jnp.bfloat16)],
        ),
        compiler_params=pltpu.CompilerParams(
            # qi must be "arbitrary": query tiles reuse the normalized-K scratch.
            dimension_semantics=("parallel", "parallel", "arbitrary"),
            vmem_limit_bytes=32 * 1024 * 1024,
        ),
    )(qkv, qkv, qkv, null_k, null_v, qs2, ks2)


# --------------------------------------------------------------------------
# Full Attention.forward (self-attention path; cross_attend=False, dropout=0)
# --------------------------------------------------------------------------
def attention_forward(x, params, *, heads, dim_head, scale=8.0):
    # TODO(synk): cross-attention (context / context_mask) branch not implemented;
    # module defaults (cross_attend=False, dropout=0.0) are the path exercised here.
    b, n, dim = x.shape
    inner = heads * dim_head

    # Fused [w_q | w_kv] weight -> one LN+projection kernel (xn never hits HBM).
    w_qkv = jnp.concatenate([params["w_q"], params["w_kv"]], axis=-1)
    qkv = ln_qkv_proj(x.reshape(b * n, dim), params["gamma"], params["beta"], w_qkv)
    qkv3 = qkv.reshape(b, n, 3 * inner)

    null_k = params["null_kv"][0].reshape(1, inner)
    null_v = params["null_kv"][1].reshape(1, inner)

    out = fused_attention(qkv3, null_k, null_v,
                          params["q_scale"], params["k_scale"],
                          heads=heads, dim_head=dim_head, scale=scale)

    # out is already in the merged (b, n, h*d) layout -> straight into to_out.
    return linear(out, params["w_out"])


if __name__ == "__main__":
    key = jax.random.PRNGKey(0)
    batch, seq = 2, 8
    dim, heads, dim_head = 128, 8, 64
    inner = heads * dim_head
    scale = 8.0                              # module default

    k0, k1, k2, k3, k4 = jax.random.split(key, 5)
    x = jax.random.normal(k0, (batch, seq, dim), dtype=jnp.float32)

    params = {
        "gamma": jnp.ones((dim,), jnp.float32),
        "beta": jnp.zeros((dim,), jnp.float32),
        "null_kv": jax.random.normal(k1, (2, heads, 1, dim_head), jnp.float32),
        "w_q": jax.random.normal(k2, (dim, inner), jnp.float32) / math.sqrt(dim),
        "w_kv": jax.random.normal(k3, (dim, 2 * inner), jnp.float32) / math.sqrt(dim),
        "q_scale": jnp.ones((dim_head,), jnp.float32),
        "k_scale": jnp.ones((dim_head,), jnp.float32),
        "w_out": jax.random.normal(k4, (inner, dim), jnp.float32) / math.sqrt(inner),
    }

    fwd = jax.jit(functools.partial(
        attention_forward, heads=heads, dim_head=dim_head, scale=scale))
    y = jax.block_until_ready(fwd(x, params))

    # Pure-JAX reference.  mm_dtype controls the matmul operand precision so we
    # can check both against a bf16-MXU-matched reference (tight tolerance) and
    # the full-f32 torch-equivalent forward (looser tolerance for bf16 operands).
    def ref_forward(x, mm_dtype):
        c = lambda t: t.astype(mm_dtype)
        mean = jnp.mean(x, axis=-1, keepdims=True)
        var = jnp.mean((x - mean) ** 2, axis=-1, keepdims=True)
        xn = (x - mean) / jnp.sqrt(var + LN_EPS) * params["gamma"] + params["beta"]
        q = jnp.matmul(c(xn), c(params["w_q"]), preferred_element_type=jnp.float32)
        kv = jnp.matmul(c(xn), c(params["w_kv"]), preferred_element_type=jnp.float32)
        k, v = jnp.split(kv, 2, axis=-1)

        def sh(t):
            return t.reshape(batch, seq, heads, dim_head).transpose(0, 2, 1, 3)
        q, k, v = map(sh, (q, k, v))
        nk, nv = params["null_kv"]
        nk = jnp.broadcast_to(nk[None], (batch, heads, 1, dim_head))
        nv = jnp.broadcast_to(nv[None], (batch, heads, 1, dim_head))
        k = jnp.concatenate([nk, k], axis=2)
        v = jnp.concatenate([nv, v], axis=2)

        def l2n(t):
            return t / jnp.maximum(
                jnp.linalg.norm(t, axis=-1, keepdims=True), 1e-12)
        q = l2n(q) * params["q_scale"] * scale
        k = l2n(k) * params["k_scale"]
        sim = jnp.einsum("bhid,bhjd->bhij", c(q), c(k),
                         preferred_element_type=jnp.float32)
        attn = jax.nn.softmax(sim, axis=-1)
        o = jnp.einsum("bhij,bhjd->bhid", c(attn), c(v),
                       preferred_element_type=jnp.float32)
        o = o.transpose(0, 2, 1, 3).reshape(batch, seq, inner)
        return jnp.matmul(c(o), c(params["w_out"]),
                          preferred_element_type=jnp.float32)

    ref_bf16 = ref_forward(x, jnp.bfloat16)   # matches kernel's MXU precision
    ref_f32 = ref_forward(x, jnp.float32)     # torch-equivalent f32 forward
    d_bf16 = float(jnp.max(jnp.abs(y - ref_bf16)))
    d_f32 = float(jnp.max(jnp.abs(y - ref_f32)))
    assert jnp.allclose(y, ref_bf16, atol=2e-2, rtol=2e-2), (
        f"mismatch vs bf16-matmul reference, max abs diff = {d_bf16}")
    assert jnp.allclose(y, ref_f32, atol=1.5e-1, rtol=1.5e-1), (
        f"mismatch vs f32 reference, max abs diff = {d_f32}")

    print("KERNEL_OK")
</pallas_src>

<mosaic_0001>
module attributes {stable_mosaic.version = 11 : i64} {
  func.func @_ln_qkv_kernel(%arg0: i32, %arg1: i32, %arg2: memref<16x128xf32, #tpu.memory_space<vmem>>, %arg3: memref<1x128xf32, #tpu.memory_space<vmem>>, %arg4: memref<1x128xf32, #tpu.memory_space<vmem>>, %arg5: memref<128x512xf32, #tpu.memory_space<vmem>>, %arg6: memref<16x512xf32, #tpu.memory_space<vmem>>, %arg7: memref<16x128xbf16, #tpu.memory_space<vmem>>) attributes {dimension_semantics = [#tpu.dimension_semantics<parallel>, #tpu.dimension_semantics<arbitrary>], iteration_bounds = array<i64: 1, 3>, scalar_prefetch = 0 : i64, scratch_operands = 1 : i64, tpu.core_type = #tpu.core_type<tc>, window_params = [{transform_indices = @transform_0, window_bounds = array<i64: 16, 128>}, {pipeline_mode = #tpu.pipeline_mode<synchronous>, transform_indices = @transform_1, window_bounds = array<i64: 1, 128>}, {pipeline_mode = #tpu.pipeline_mode<synchronous>, transform_indices = @transform_2, window_bounds = array<i64: 1, 128>}, {transform_indices = @transform_3, window_bounds = array<i64: 128, 512>}, {transform_indices = @transform_4, window_bounds = array<i64: 16, 512>}]} {
    %c0_i32 = arith.constant 0 : i32
    %0 = arith.cmpi eq, %arg1, %c0_i32 : i32
    %1 = arith.extui %0 : i1 to i32
    %c0_i32_0 = arith.constant 0 : i32
    %2 = arith.cmpi ne, %1, %c0_i32_0 : i32
    scf.if %2 {
      %c0_6 = arith.constant 0 : index
      %c0_7 = arith.constant 0 : index
      %8 = vector.load %arg2[%c0_6, %c0_7] : memref<16x128xf32, #tpu.memory_space<vmem>>, vector<16x128xf32>
      %cst_8 = arith.constant dense<0.000000e+00> : vector<16xf32>
      %9 = vector.multi_reduction <add>, %8, %cst_8 [1] : vector<16x128xf32> to vector<16xf32>
      %10 = vector.shape_cast %9 : vector<16xf32> to vector<16x1xf32>
      %cst_9 = arith.constant 1.280000e+02 : f32
      %11 = vector.broadcast %cst_9 : f32 to vector<16x1xf32>
      %12 = arith.divf %10, %11 : vector<16x1xf32>
      %13 = vector.broadcast %12 : vector<16x1xf32> to vector<16x128xf32>
      %14 = arith.subf %8, %13 : vector<16x128xf32>
      %15 = arith.mulf %14, %14 : vector<16x128xf32>
      %cst_10 = arith.constant dense<0.000000e+00> : vector<16xf32>
      %16 = vector.multi_reduction <add>, %15, %cst_10 [1] : vector<16x128xf32> to vector<16xf32>
      %17 = vector.shape_cast %16 : vector<16xf32> to vector<16x1xf32>
      %cst_11 = arith.constant 1.280000e+02 : f32
      %18 = vector.broadcast %cst_11 : f32 to vector<16x1xf32>
      %19 = arith.divf %17, %18 : vector<16x1xf32>
      %cst_12 = arith.constant 9.99999974E-6 : f32
      %20 = vector.broadcast %cst_12 : f32 to vector<16x1xf32>
      %21 = arith.addf %19, %20 : vector<16x1xf32>
      %22 = math.rsqrt %21 : vector<16x1xf32>
      %23 = vector.broadcast %22 : vector<16x1xf32> to vector<16x128xf32>
      %24 = arith.mulf %14, %23 : vector<16x128xf32>
      %c0_13 = arith.constant 0 : index
      %c0_14 = arith.constant 0 : index
      %25 = vector.load %arg3[%c0_13, %c0_14] : memref<1x128xf32, #tpu.memory_space<vmem>>, vector<1x128xf32>
      %26 = vector.broadcast %25 : vector<1x128xf32> to vector<16x128xf32>
      %27 = arith.mulf %24, %26 : vector<16x128xf32>
      %c0_15 = arith.constant 0 : index
      %c0_16 = arith.constant 0 : index
      %28 = vector.load %arg4[%c0_15, %c0_16] : memref<1x128xf32, #tpu.memory_space<vmem>>, vector<1x128xf32>
      %29 = vector.broadcast %28 : vector<1x128xf32> to vector<16x128xf32>
      %30 = arith.addf %27, %29 : vector<16x128xf32>
      %31 = arith.truncf %30 : vector<16x128xf32> to vector<16x128xbf16>
      %c0_17 = arith.constant 0 : index
      %c0_18 = arith.constant 0 : index
      %32 = vector.load %arg7[%c0_17, %c0_18] : memref<16x128xbf16, #tpu.memory_space<vmem>>, vector<16x128xbf16>
      tpu.vector_store %arg7[%c0_17, %c0_18], %31 {strides = array<i32>} : memref<16x128xbf16, #tpu.memory_space<vmem>>, vector<16x128xbf16>,
    } else {
    }
    %c0 = arith.constant 0 : index
    %c0_1 = arith.constant 0 : index
    %3 = vector.load %arg7[%c0, %c0_1] : memref<16x128xbf16, #tpu.memory_space<vmem>>, vector<16x128xbf16>
    %c0_2 = arith.constant 0 : index
    %c0_3 = arith.constant 0 : index
    %4 = vector.load %arg5[%c0_2, %c0_3] : memref<128x512xf32, #tpu.memory_space<vmem>>, vector<128x512xf32>
    %5 = arith.truncf %4 : vector<128x512xf32> to vector<128x512xbf16>
    %cst = arith.constant dense<0.000000e+00> : vector<16x512xf32>
    %6 = tpu.matmul %3, %5, %cst {dimension_numbers = #tpu.dot_dimension_numbers<[1], [0], [0], [1], [0, 0, 1, 1], [], []>} : vector<16x128xbf16>, vector<128x512xbf16>, vector<16x512xf32> -> vector<16x512xf32>
    %c0_4 = arith.constant 0 : index
    %c0_5 = arith.constant 0 : index
    %7 = vector.load %arg6[%c0_4, %c0_5] : memref<16x512xf32, #tpu.memory_space<vmem>>, vector<16x512xf32>
    tpu.vector_store %arg6[%c0_4, %c0_5], %6 {strides = array<i32>} : memref<16x512xf32, #tpu.memory_space<vmem>>, vector<16x512xf32>,
    return
  }
  func.func @transform_0(%arg0: i32, %arg1: i32) -> (i32, i32) {
    %c0_i32 = arith.constant 0 : i32
    %c0_i32_0 = arith.constant 0 : i32
    return %arg0, %c0_i32 : i32, i32
  }
  func.func @transform_1(%arg0: i32, %arg1: i32) -> (i32, i32) {
    %c0_i32 = arith.constant 0 : i32
    %c0_i32_0 = arith.constant 0 : i32
    %c0_i32_1 = arith.constant 0 : i32
    return %c0_i32, %c0_i32_0 : i32, i32
  }
  func.func @transform_2(%arg0: i32, %arg1: i32) -> (i32, i32) {
    %c0_i32 = arith.constant 0 : i32
    %c0_i32_0 = arith.constant 0 : i32
    %c0_i32_1 = arith.constant 0 : i32
    return %c0_i32, %c0_i32_0 : i32, i32
  }
  func.func @transform_3(%arg0: i32, %arg1: i32) -> (i32, i32) {
    %c0_i32 = arith.constant 0 : i32
    %c0_i32_0 = arith.constant 0 : i32
    return %c0_i32, %arg1 : i32, i32
  }
  func.func @transform_4(%arg0: i32, %arg1: i32) -> (i32, i32) {
    %c0_i32 = arith.constant 0 : i32
    return %arg0, %arg1 : i32, i32
  }
}

module attributes {stable_mosaic.version = 11 : i64} {
  func.func @_matmul_kernel(%arg0: i32, %arg1: i32, %arg2: i32, %arg3: memref<16x512xf32, #tpu.memory_space<vmem>>, %arg4: memref<512x128xf32, #tpu.memory_space<vmem>>, %arg5: memref<16x128xf32, #tpu.memory_space<vmem>>, %arg6: memref<16x128xf32, #tpu.memory_space<vmem>>) attributes {dimension_semantics = [#tpu.dimension_semantics<parallel>, #tpu.dimension_semantics<parallel>, #tpu.dimension_semantics<arbitrary>], iteration_bounds = array<i64: 1, 1, 1>, scalar_prefetch = 0 : i64, scratch_operands = 1 : i64, tpu.core_type = #tpu.core_type<tc>, window_params = [{transform_indices = @transform_0, window_bounds = array<i64: 16, 512>}, {transform_indices = @transform_1, window_bounds = array<i64: 512, 128>}, {transform_indices = @transform_2, window_bounds = array<i64: 16, 128>}]} {
    %c0_i32 = arith.constant 0 : i32
    %0 = arith.cmpi eq, %arg2, %c0_i32 : i32
    %1 = arith.extui %0 : i1 to i32
    %c0_i32_0 = arith.constant 0 : i32
    %2 = arith.cmpi ne, %1, %c0_i32_0 : i32
    scf.if %2 {
      %cst_10 = arith.constant 0.000000e+00 : f32
      %14 = vector.broadcast %cst_10 : f32 to vector<16x128xf32>
      %c0_11 = arith.constant 0 : index
      %c0_12 = arith.constant 0 : index
      %15 = vector.load %arg6[%c0_11, %c0_12] : memref<16x128xf32, #tpu.memory_space<vmem>>, vector<16x128xf32>
      tpu.vector_store %arg6[%c0_11, %c0_12], %14 {strides = array<i32>} : memref<16x128xf32, #tpu.memory_space<vmem>>, vector<16x128xf32>,
    } else {
    }
    %c0 = arith.constant 0 : index
    %c0_1 = arith.constant 0 : index
    %3 = vector.load %arg6[%c0, %c0_1] : memref<16x128xf32, #tpu.memory_space<vmem>>, vector<16x128xf32>
    %c0_2 = arith.constant 0 : index
    %c0_3 = arith.constant 0 : index
    %4 = vector.load %arg3[%c0_2, %c0_3] : memref<16x512xf32, #tpu.memory_space<vmem>>, vector<16x512xf32>
    %5 = arith.truncf %4 : vector<16x512xf32> to vector<16x512xbf16>
    %c0_4 = arith.constant 0 : index
    %c0_5 = arith.constant 0 : index
    %6 = vector.load %arg4[%c0_4, %c0_5] : memref<512x128xf32, #tpu.memory_space<vmem>>, vector<512x128xf32>
    %7 = arith.truncf %6 : vector<512x128xf32> to vector<512x128xbf16>
    %cst = arith.constant dense<0.000000e+00> : vector<16x128xf32>
    %8 = tpu.matmul %5, %7, %cst {dimension_numbers = #tpu.dot_dimension_numbers<[1], [0], [0], [1], [0, 0, 1, 1], [], []>} : vector<16x512xbf16>, vector<512x128xbf16>, vector<16x128xf32> -> vector<16x128xf32>
    %9 = arith.addf %3, %8 : vector<16x128xf32>
    %c0_6 = arith.constant 0 : index
    %c0_7 = arith.constant 0 : index
    %10 = vector.load %arg6[%c0_6, %c0_7] : memref<16x128xf32, #tpu.memory_space<vmem>>, vector<16x128xf32>
    tpu.vector_store %arg6[%c0_6, %c0_7], %9 {strides = array<i32>} : memref<16x128xf32, #tpu.memory_space<vmem>>, vector<16x128xf32>,
    %c0_i32_8 = arith.constant 0 : i32
    %11 = arith.cmpi eq, %arg2, %c0_i32_8 : i32
    %12 = arith.extui %11 : i1 to i32
    %c0_i32_9 = arith.constant 0 : i32
    %13 = arith.cmpi ne, %12, %c0_i32_9 : i32
    scf.if %13 {
      %c0_10 = arith.constant 0 : index
      %c0_11 = arith.constant 0 : index
      %14 = vector.load %arg6[%c0_10, %c0_11] : memref<16x128xf32, #tpu.memory_space<vmem>>, vector<16x128xf32>
      %c0_12 = arith.constant 0 : index
      %c0_13 = arith.constant 0 : index
      %15 = vector.load %arg5[%c0_12, %c0_13] : memref<16x128xf32, #tpu.memory_space<vmem>>, vector<16x128xf32>
      tpu.vector_store %arg5[%c0_12, %c0_13], %14 {strides = array<i32>} : memref<16x128xf32, #tpu.memory_space<vmem>>, vector<16x128xf32>,
    } else {
    }
    return
  }
  func.func @transform_0(%arg0: i32, %arg1: i32, %arg2: i32) -> (i32, i32) {
    %c0_i32 = arith.constant 0 : i32
    return %arg0, %arg2 : i32, i32
  }
  func.func @transform_1(%arg0: i32, %arg1: i32, %arg2: i32) -> (i32, i32) {
    %c0_i32 = arith.constant 0 : i32
    return %arg2, %arg1 : i32, i32
  }
  func.func @transform_2(%arg0: i32, %arg1: i32, %arg2: i32) -> (i32, i32) {
    %c0_i32 = arith.constant 0 : i32
    return %arg0, %arg1 : i32, i32
  }
}

module attributes {stable_mosaic.version = 11 : i64} {
  func.func @_attn_kernel(%arg0: i32, %arg1: i32, %arg2: i32, %arg3: memref<1x8x128xf32, #tpu.memory_space<vmem>>, %arg4: memref<1x8x128xf32, #tpu.memory_space<vmem>>, %arg5: memref<1x8x128xf32, #tpu.memory_space<vmem>>, %arg6: memref<1x128xf32, #tpu.memory_space<vmem>>, %arg7: memref<1x128xf32, #tpu.memory_space<vmem>>, %arg8: memref<1x64xf32, #tpu.memory_space<vmem>>, %arg9: memref<1x64xf32, #tpu.memory_space<vmem>>, %arg10: memref<1x8x128xf32, #tpu.memory_space<vmem>>, %arg11: memref<8x128xbf16, #tpu.memory_space<vmem>>) attributes {dimension_semantics = [#tpu.dimension_semantics<parallel>, #tpu.dimension_semantics<parallel>, #tpu.dimension_semantics<arbitrary>], iteration_bounds = array<i64: 2, 4, 1>, scalar_prefetch = 0 : i64, scratch_operands = 1 : i64, tpu.core_type = #tpu.core_type<tc>, window_params = [{transform_indices = @transform_0, window_bounds = array<i64: 1, 8, 128>}, {transform_indices = @transform_1, window_bounds = array<i64: 1, 8, 128>}, {transform_indices = @transform_2, window_bounds = array<i64: 1, 8, 128>}, {transform_indices = @transform_3, window_bounds = array<i64: 1, 128>}, {transform_indices = @transform_4, window_bounds = array<i64: 1, 128>}, {pipeline_mode = #tpu.pipeline_mode<synchronous>, transform_indices = @transform_5, window_bounds = array<i64: 1, 64>}, {pipeline_mode = #tpu.pipeline_mode<synchronous>, transform_indices = @transform_6, window_bounds = array<i64: 1, 64>}, {transform_indices = @transform_7, window_bounds = array<i64: 1, 8, 128>}]} {
    %c0 = arith.constant 0 : index
    %c0_0 = arith.constant 0 : index
    %0 = vector.load %arg9[%c0, %c0_0] : memref<1x64xf32, #tpu.memory_space<vmem>>, vector<1x64xf32>
    %c0_1 = arith.constant 0 : index
    %c0_2 = arith.constant 0 : index
    %1 = vector.load %arg8[%c0_1, %c0_2] : memref<1x64xf32, #tpu.memory_space<vmem>>, vector<1x64xf32>
    %cst = arith.constant 8.000000e+00 : f32
    %2 = vector.broadcast %cst : f32 to vector<1x64xf32>
    %3 = arith.mulf %1, %2 : vector<1x64xf32>
    %c0_i32 = arith.constant 0 : i32
    %4 = arith.cmpi eq, %arg2, %c0_i32 : i32
    %5 = arith.extui %4 : i1 to i32
    %c0_i32_3 = arith.constant 0 : i32
    %6 = arith.cmpi ne, %5, %c0_i32_3 : i32
    scf.if %6 {
      %c0_45 = arith.constant 0 : index
      %c0_46 = arith.constant 0 : index
      %c0_47 = arith.constant 0 : index
      %117 = vector.load %arg4[%c0_45, %c0_46, %c0_47] : memref<1x8x128xf32, #tpu.memory_space<vmem>>, vector<1x8x128xf32>
      %118 = vector.shape_cast %117 : vector<1x8x128xf32> to vector<8x128xf32>
      %119 = vector.extract_strided_slice %118 {offsets = [0, 0], sizes = [8, 64], strides = [1, 1]} : vector<8x128xf32> to vector<8x64xf32>
      %120 = arith.mulf %119, %119 : vector<8x64xf32>
      %cst_48 = arith.constant dense<0.000000e+00> : vector<8xf32>
      %121 = vector.multi_reduction <add>, %120, %cst_48 [1] : vector<8x64xf32> to vector<8xf32>
      %122 = vector.shape_cast %121 : vector<8xf32> to vector<8x1xf32>
      %cst_49 = arith.constant 1.000000e-24 : f32
      %123 = vector.broadcast %cst_49 : f32 to vector<8x1xf32>
      %124 = arith.maximumf %122, %123 : vector<8x1xf32>
      %125 = math.rsqrt %124 : vector<8x1xf32>
      %126 = vector.broadcast %125 : vector<8x1xf32> to vector<8x64xf32>
      %127 = arith.mulf %119, %126 : vector<8x64xf32>
      %128 = vector.broadcast %0 : vector<1x64xf32> to vector<8x64xf32>
      %129 = arith.mulf %127, %128 : vector<8x64xf32>
      %130 = arith.truncf %129 : vector<8x64xf32> to vector<8x64xbf16>
      %c0_50 = arith.constant 0 : index
      %c0_51 = arith.constant 0 : index
      %131 = vector.load %arg11[%c0_50, %c0_51] : memref<8x128xbf16, #tpu.memory_space<vmem>>, vector<8x64xbf16>
      tpu.vector_store %arg11[%c0_50, %c0_51], %130 {strides = array<i32>} : memref<8x128xbf16, #tpu.memory_space<vmem>>, vector<8x64xbf16>,
      %132 = vector.extract_strided_slice %118 {offsets = [0, 64], sizes = [8, 64], strides = [1, 1]} : vector<8x128xf32> to vector<8x64xf32>
      %133 = arith.mulf %132, %132 : vector<8x64xf32>
      %cst_52 = arith.constant dense<0.000000e+00> : vector<8xf32>
      %134 = vector.multi_reduction <add>, %133, %cst_52 [1] : vector<8x64xf32> to vector<8xf32>
      %135 = vector.shape_cast %134 : vector<8xf32> to vector<8x1xf32>
      %cst_53 = arith.constant 1.000000e-24 : f32
      %136 = vector.broadcast %cst_53 : f32 to vector<8x1xf32>
      %137 = arith.maximumf %135, %136 : vector<8x1xf32>
      %138 = math.rsqrt %137 : vector<8x1xf32>
      %139 = vector.broadcast %138 : vector<8x1xf32> to vector<8x64xf32>
      %140 = arith.mulf %132, %139 : vector<8x64xf32>
      %141 = vector.broadcast %0 : vector<1x64xf32> to vector<8x64xf32>
      %142 = arith.mulf %140, %141 : vector<8x64xf32>
      %143 = arith.truncf %142 : vector<8x64xf32> to vector<8x64xbf16>
      %c0_54 = arith.constant 0 : index
      %c64_55 = arith.constant 64 : index
      %144 = vector.load %arg11[%c0_54, %c64_55] : memref<8x128xbf16, #tpu.memory_space<vmem>>, vector<8x64xbf16>
      tpu.vector_store %arg11[%c0_54, %c64_55], %143 {strides = array<i32>} : memref<8x128xbf16, #tpu.memory_space<vmem>>, vector<8x64xbf16>,
    } else {
    }
    %c0_4 = arith.constant 0 : index
    %c0_5 = arith.constant 0 : index
    %c0_6 = arith.constant 0 : index
    %7 = vector.load %arg3[%c0_4, %c0_5, %c0_6] : memref<1x8x128xf32, #tpu.memory_space<vmem>>, vector<1x8x128xf32>
    %8 = vector.shape_cast %7 : vector<1x8x128xf32> to vector<8x128xf32>
    %9 = vector.extract_strided_slice %8 {offsets = [0, 0], sizes = [8, 64], strides = [1, 1]} : vector<8x128xf32> to vector<8x64xf32>
    %10 = arith.mulf %9, %9 : vector<8x64xf32>
    %cst_7 = arith.constant dense<0.000000e+00> : vector<8xf32>
    %11 = vector.multi_reduction <add>, %10, %cst_7 [1] : vector<8x64xf32> to vector<8xf32>
    %12 = vector.shape_cast %11 : vector<8xf32> to vector<8x1xf32>
    %cst_8 = arith.constant 1.000000e-24 : f32
    %13 = vector.broadcast %cst_8 : f32 to vector<8x1xf32>
    %14 = arith.maximumf %12, %13 : vector<8x1xf32>
    %15 = math.rsqrt %14 : vector<8x1xf32>
    %16 = vector.broadcast %15 : vector<8x1xf32> to vector<8x64xf32>
    %17 = arith.mulf %9, %16 : vector<8x64xf32>
    %18 = vector.broadcast %3 : vector<1x64xf32> to vector<8x64xf32>
    %19 = arith.mulf %17, %18 : vector<8x64xf32>
    %c0_9 = arith.constant 0 : index
    %c0_10 = arith.constant 0 : index
    %20 = vector.load %arg6[%c0_9, %c0_10] : memref<1x128xf32, #tpu.memory_space<vmem>>, vector<1x64xf32>
    %21 = arith.mulf %20, %20 : vector<1x64xf32>
    %cst_11 = arith.constant dense<0.000000e+00> : vector<1xf32>
    %22 = vector.multi_reduction <add>, %21, %cst_11 [1] : vector<1x64xf32> to vector<1xf32>
    %23 = vector.shape_cast %22 : vector<1xf32> to vector<1x1xf32>
    %cst_12 = arith.constant 1.000000e-24 : f32
    %24 = vector.broadcast %cst_12 : f32 to vector<1x1xf32>
    %25 = arith.maximumf %23, %24 : vector<1x1xf32>
    %26 = math.rsqrt %25 : vector<1x1xf32>
    %27 = vector.broadcast %26 : vector<1x1xf32> to vector<1x64xf32>
    %28 = arith.mulf %20, %27 : vector<1x64xf32>
    %29 = arith.mulf %28, %0 : vector<1x64xf32>
    %c0_13 = arith.constant 0 : index
    %c0_14 = arith.constant 0 : index
    %30 = vector.load %arg7[%c0_13, %c0_14] : memref<1x128xf32, #tpu.memory_space<vmem>>, vector<1x64xf32>
    %31 = arith.truncf %19 : vector<8x64xf32> to vector<8x64xbf16>
    %c0_15 = arith.constant 0 : index
    %c0_16 = arith.constant 0 : index
    %32 = vector.load %arg11[%c0_15, %c0_16] : memref<8x128xbf16, #tpu.memory_space<vmem>>, vector<8x64xbf16>
    %cst_17 = arith.constant dense<0.000000e+00> : vector<8x8xf32>
    %33 = tpu.matmul %31, %32, %cst_17 {dimension_numbers = #tpu.dot_dimension_numbers<[1], [1], [0], [0], [0, 0, 1, 0], [], []>} : vector<8x64xbf16>, vector<8x64xbf16>, vector<8x8xf32> -> vector<8x8xf32>
    %34 = vector.broadcast %29 : vector<1x64xf32> to vector<8x64xf32>
    %35 = arith.mulf %19, %34 : vector<8x64xf32>
    %cst_18 = arith.constant dense<0.000000e+00> : vector<8xf32>
    %36 = vector.multi_reduction <add>, %35, %cst_18 [1] : vector<8x64xf32> to vector<8xf32>
    %37 = vector.shape_cast %36 : vector<8xf32> to vector<8x1xf32>
    %cst_19 = arith.constant dense<0xFF800000> : vector<8xf32>
    %38 = vector.multi_reduction <maximumf>, %33, %cst_19 [1] : vector<8x8xf32> to vector<8xf32>
    %39 = vector.shape_cast %38 : vector<8xf32> to vector<8x1xf32>
    %40 = arith.maximumf %39, %37 : vector<8x1xf32>
    %41 = vector.broadcast %40 : vector<8x1xf32> to vector<8x8xf32>
    %42 = arith.subf %33, %41 : vector<8x8xf32>
    %43 = math.exp %42 : vector<8x8xf32>
    %44 = arith.subf %37, %40 : vector<8x1xf32>
    %45 = math.exp %44 : vector<8x1xf32>
    %cst_20 = arith.constant dense<0.000000e+00> : vector<8xf32>
    %46 = vector.multi_reduction <add>, %43, %cst_20 [1] : vector<8x8xf32> to vector<8xf32>
    %47 = vector.shape_cast %46 : vector<8xf32> to vector<8x1xf32>
    %48 = arith.addf %47, %45 : vector<8x1xf32>
    %49 = tpu.reciprocal %48 {approx = true} : vector<8x1xf32> -> vector<8x1xf32>
    %50 = arith.truncf %43 : vector<8x8xf32> to vector<8x8xbf16>
    %c0_21 = arith.constant 0 : index
    %c0_22 = arith.constant 0 : index
    %c0_23 = arith.constant 0 : index
    %51 = vector.load %arg5[%c0_21, %c0_22, %c0_23] : memref<1x8x128xf32, #tpu.memory_space<vmem>>, vector<1x8x64xf32>
    %52 = vector.shape_cast %51 : vector<1x8x64xf32> to vector<8x64xf32>
    %53 = arith.truncf %52 : vector<8x64xf32> to vector<8x64xbf16>
    %cst_24 = arith.constant dense<0.000000e+00> : vector<8x64xf32>
    %54 = tpu.matmul %50, %53, %cst_24 {dimension_numbers = #tpu.dot_dimension_numbers<[1], [0], [0], [1], [0, 0, 1, 1], [], []>} : vector<8x8xbf16>, vector<8x64xbf16>, vector<8x64xf32> -> vector<8x64xf32>
    %55 = vector.broadcast %45 : vector<8x1xf32> to vector<8x64xf32>
    %56 = vector.broadcast %30 : vector<1x64xf32> to vector<8x64xf32>
    %57 = arith.mulf %55, %56 : vector<8x64xf32>
    %58 = arith.addf %54, %57 : vector<8x64xf32>
    %59 = vector.broadcast %49 : vector<8x1xf32> to vector<8x64xf32>
    %60 = arith.mulf %58, %59 : vector<8x64xf32>
    %61 = vector.extract_strided_slice %8 {offsets = [0, 64], sizes = [8, 64], strides = [1, 1]} : vector<8x128xf32> to vector<8x64xf32>
    %62 = arith.mulf %61, %61 : vector<8x64xf32>
    %cst_25 = arith.constant dense<0.000000e+00> : vector<8xf32>
    %63 = vector.multi_reduction <add>, %62, %cst_25 [1] : vector<8x64xf32> to vector<8xf32>
    %64 = vector.shape_cast %63 : vector<8xf32> to vector<8x1xf32>
    %cst_26 = arith.constant 1.000000e-24 : f32
    %65 = vector.broadcast %cst_26 : f32 to vector<8x1xf32>
    %66 = arith.maximumf %64, %65 : vector<8x1xf32>
    %67 = math.rsqrt %66 : vector<8x1xf32>
    %68 = vector.broadcast %67 : vector<8x1xf32> to vector<8x64xf32>
    %69 = arith.mulf %61, %68 : vector<8x64xf32>
    %70 = vector.broadcast %3 : vector<1x64xf32> to vector<8x64xf32>
    %71 = arith.mulf %69, %70 : vector<8x64xf32>
    %c0_27 = arith.constant 0 : index
    %c64 = arith.constant 64 : index
    %72 = vector.load %arg6[%c0_27, %c64] : memref<1x128xf32, #tpu.memory_space<vmem>>, vector<1x64xf32>
    %73 = arith.mulf %72, %72 : vector<1x64xf32>
    %cst_28 = arith.constant dense<0.000000e+00> : vector<1xf32>
    %74 = vector.multi_reduction <add>, %73, %cst_28 [1] : vector<1x64xf32> to vector<1xf32>
    %75 = vector.shape_cast %74 : vector<1xf32> to vector<1x1xf32>
    %cst_29 = arith.constant 1.000000e-24 : f32
    %76 = vector.broadcast %cst_29 : f32 to vector<1x1xf32>
    %77 = arith.maximumf %75, %76 : vector<1x1xf32>
    %78 = math.rsqrt %77 : vector<1x1xf32>
    %79 = vector.broadcast %78 : vector<1x1xf32> to vector<1x64xf32>
    %80 = arith.mulf %72, %79 : vector<1x64xf32>
    %81 = arith.mulf %80, %0 : vector<1x64xf32>
    %c0_30 = arith.constant 0 : index
    %c64_31 = arith.constant 64 : index
    %82 = vector.load %arg7[%c0_30, %c64_31] : memref<1x128xf32, #tpu.memory_space<vmem>>, vector<1x64xf32>
    %83 = arith.truncf %71 : vector<8x64xf32> to vector<8x64xbf16>
    %c0_32 = arith.constant 0 : index
    %c64_33 = arith.constant 64 : index
    %84 = vector.load %arg11[%c0_32, %c64_33] : memref<8x128xbf16, #tpu.memory_space<vmem>>, vector<8x64xbf16>
    %cst_34 = arith.constant dense<0.000000e+00> : vector<8x8xf32>
    %85 = tpu.matmul %83, %84, %cst_34 {dimension_numbers = #tpu.dot_dimension_numbers<[1], [1], [0], [0], [0, 0, 1, 0], [], []>} : vector<8x64xbf16>, vector<8x64xbf16>, vector<8x8xf32> -> vector<8x8xf32>
    %86 = vector.broadcast %81 : vector<1x64xf32> to vector<8x64xf32>
    %87 = arith.mulf %71, %86 : vector<8x64xf32>
    %cst_35 = arith.constant dense<0.000000e+00> : vector<8xf32>
    %88 = vector.multi_reduction <add>, %87, %cst_35 [1] : vector<8x64xf32> to vector<8xf32>
    %89 = vector.shape_cast %88 : vector<8xf32> to vector<8x1xf32>
    %cst_36 = arith.constant dense<0xFF800000> : vector<8xf32>
    %90 = vector.multi_reduction <maximumf>, %85, %cst_36 [1] : vector<8x8xf32> to vector<8xf32>
    %91 = vector.shape_cast %90 : vector<8xf32> to vector<8x1xf32>
    %92 = arith.maximumf %91, %89 : vector<8x1xf32>
    %93 = vector.broadcast %92 : vector<8x1xf32> to vector<8x8xf32>
    %94 = arith.subf %85, %93 : vector<8x8xf32>
    %95 = math.exp %94 : vector<8x8xf32>
    %96 = arith.subf %89, %92 : vector<8x1xf32>
    %97 = math.exp %96 : vector<8x1xf32>
    %cst_37 = arith.constant dense<0.000000e+00> : vector<8xf32>
    %98 = vector.multi_reduction <add>, %95, %cst_37 [1] : vector<8x8xf32> to vector<8xf32>
    %99 = vector.shape_cast %98 : vector<8xf32> to vector<8x1xf32>
    %100 = arith.addf %99, %97 : vector<8x1xf32>
    %101 = tpu.reciprocal %100 {approx = true} : vector<8x1xf32> -> vector<8x1xf32>
    %102 = arith.truncf %95 : vector<8x8xf32> to vector<8x8xbf16>
    %c0_38 = arith.constant 0 : index
    %c0_39 = arith.constant 0 : index
    %c64_40 = arith.constant 64 : index
    %103 = vector.load %arg5[%c0_38, %c0_39, %c64_40] : memref<1x8x128xf32, #tpu.memory_space<vmem>>, vector<1x8x64xf32>
    %104 = vector.shape_cast %103 : vector<1x8x64xf32> to vector<8x64xf32>
    %105 = arith.truncf %104 : vector<8x64xf32> to vector<8x64xbf16>
    %cst_41 = arith.constant dense<0.000000e+00> : vector<8x64xf32>
    %106 = tpu.matmul %102, %105, %cst_41 {dimension_numbers = #tpu.dot_dimension_numbers<[1], [0], [0], [1], [0, 0, 1, 1], [], []>} : vector<8x8xbf16>, vector<8x64xbf16>, vector<8x64xf32> -> vector<8x64xf32>
    %107 = vector.broadcast %97 : vector<8x1xf32> to vector<8x64xf32>
    %108 = vector.broadcast %82 : vector<1x64xf32> to vector<8x64xf32>
    %109 = arith.mulf %107, %108 : vector<8x64xf32>
    %110 = arith.addf %106, %109 : vector<8x64xf32>
    %111 = vector.broadcast %101 : vector<8x1xf32> to vector<8x64xf32>
    %112 = arith.mulf %110, %111 : vector<8x64xf32>
    %113 = tpu.concatenate %60, %112 in 1 : vector<8x64xf32>, vector<8x64xf32> -> vector<8x128xf32>
    %c0_42 = arith.constant 0 : index
    %c0_43 = arith.constant 0 : index
    %c0_44 = arith.constant 0 : index
    %114 = vector.load %arg10[%c0_42, %c0_43, %c0_44] : memref<1x8x128xf32, #tpu.memory_space<vmem>>, vector<1x8x128xf32>
    %115 = vector.shape_cast %114 : vector<1x8x128xf32> to vector<8x128xf32>
    %116 = vector.shape_cast %113 : vector<8x128xf32> to vector<1x8x128xf32>
    tpu.vector_store %arg10[%c0_42, %c0_43, %c0_44], %116 {strides = array<i32>} : memref<1x8x128xf32, #tpu.memory_space<vmem>>, vector<1x8x128xf32>,
    return
  }
  func.func @transform_0(%arg0: i32, %arg1: i32, %arg2: i32) -> (i32, i32, i32) {
    %c0_i32 = arith.constant 0 : i32
    return %arg0, %arg2, %arg1 : i32, i32, i32
  }
  func.func @transform_1(%arg0: i32, %arg1: i32, %arg2: i32) -> (i32, i32, i32) {
    %c4_i32 = arith.constant 4 : i32
    %0 = arith.addi %c4_i32, %arg1 : i32
    %c0_i32 = arith.constant 0 : i32
    %c0_i32_0 = arith.constant 0 : i32
    return %arg0, %c0_i32, %0 : i32, i32, i32
  }
  func.func @transform_2(%arg0: i32, %arg1: i32, %arg2: i32) -> (i32, i32, i32) {
    %c8_i32 = arith.constant 8 : i32
    %0 = arith.addi %c8_i32, %arg1 : i32
    %c0_i32 = arith.constant 0 : i32
    %c0_i32_0 = arith.constant 0 : i32
    return %arg0, %c0_i32, %0 : i32, i32, i32
  }
  func.func @transform_3(%arg0: i32, %arg1: i32, %arg2: i32) -> (i32, i32) {
    %c0_i32 = arith.constant 0 : i32
    %c0_i32_0 = arith.constant 0 : i32
    return %c0_i32, %arg1 : i32, i32
  }
  func.func @transform_4(%arg0: i32, %arg1: i32, %arg2: i32) -> (i32, i32) {
    %c0_i32 = arith.constant 0 : i32
    %c0_i32_0 = arith.constant 0 : i32
    return %c0_i32, %arg1 : i32, i32
  }
  func.func @transform_5(%arg0: i32, %arg1: i32, %arg2: i32) -> (i32, i32) {
    %c0_i32 = arith.constant 0 : i32
    %c0_i32_0 = arith.constant 0 : i32
    %c0_i32_1 = arith.constant 0 : i32
    return %c0_i32, %c0_i32_0 : i32, i32
  }
  func.func @transform_6(%arg0: i32, %arg1: i32, %arg2: i32) -> (i32, i32) {
    %c0_i32 = arith.constant 0 : i32
    %c0_i32_0 = arith.constant 0 : i32
    %c0_i32_1 = arith.constant 0 : i32
    return %c0_i32, %c0_i32_0 : i32, i32
  }
  func.func @transform_7(%arg0: i32, %arg1: i32, %arg2: i32) -> (i32, i32, i32) {
    %c0_i32 = arith.constant 0 : i32
    return %arg0, %arg2, %arg1 : i32, i32, i32
  }
}

</mosaic_0001>

<bundles_post_ra>
// kernel: squeeze.2
= control target key start
LH: loop header
LB: loop body
LE: loop exit
PB: predicated region body
PF: predicated region fallthrough
CT: control target
= control target key end

     0   :  { %vm3_vm0 = vcmask 523264   ;;  %s40_s8 = smov 64   ;;  %vm9_vm1 = vcmask 1048064   ;;  %s69_s0 = inlined_call_operand.vmem [shape: f32[8,64], index: 0, kind: input, shape index: {}]   ;;  %s70_s1 = inlined_call_operand.vmem [shape: f32[1,512], index: 1, kind: output, shape index: {}]  }
   0x1   :  { %v35_v0 = vld [vmem:[%s69_s0 + $0x1] ss:$2 sm:$0xf]   ;;  %v2_v1 = vld [vmem:[%s69_s0] ss:$2 sm:$0xf]  }
   0x2   :  { %7 = vrot.lane.b32.xlu0 %v35_v0, %s40_s8  ;;  %4 = vst.msk [vmem:[#allocation0] ss:$8 sm:$0xf] %vm3_vm0, %v2_v1  }
  0x74   :  { %v8_v2 = vpop.permute.xlu0 %7  }
  0x75   :  { %10 = vst.msk [vmem:[#allocation0] ss:$8 sm:$0xf] %vm9_vm1, %v8_v2  }
  0x7c   :  { %v13_v3 = vld [vmem:[#allocation0] sm:$0x1]  ;;  %v18_v4 = vld [vmem:[#allocation0 + $0x8] sm:$0x1]  ;;  %v24_v5 = vld [vmem:[#allocation0 + $0x10] sm:$0x1] }
  0x7d   :  { %16 = vst [vmem:[%s70_s1] sm:$0x1] %v13_v3  ;;  %v30_v6 = vld [vmem:[#allocation0 + $0x18] sm:$0x1] }
  0x7e   :  { %36 = vst [vmem:[%s70_s1 + $0x1] sm:$0x1] %v18_v4 }
  0x7f   :  { %37 = vst [vmem:[%s70_s1 + $0x2] sm:$0x1] %v24_v5 }
  0x80   :  { %38 = vst [vmem:[%s70_s1 + $0x3] sm:$0x1] %v30_v6 }

// kernel: attention_forward.5
= control target key start
LH: loop header
LB: loop body
LE: loop exit
PB: predicated region body
PF: predicated region fallthrough
CT: control target
= control target key end

     0   :  { %s479_s0 = inlined_call_operand.vmem [shape: f32[16,512], index: 0, kind: input, shape index: {}]   ;;  %s480_s1 = inlined_call_operand.vmem [shape: f32[512,128], index: 1, kind: input, shape index: {}]   ;;  %s481_s2 = inlined_call_operand.hbm [shape: f32[16,128], index: 2, kind: output, shape index: {}]  }
   0x1   :  { %v46_v0 = vld [vmem:[%s480_s1 + $0x70] sm:$0xff]  ;;  %v47_v1 = vld [vmem:[%s480_s1 + $0x78] sm:$0xff]  ;;  %v44_v11 = vld [vmem:[%s480_s1 + $0x60] sm:$0xff] }
   0x2   :  { %v62_v2 = vld [vmem:[%s480_s1 + $0xf0] sm:$0xff]  ;;  %v103_v3 = vpack.c.bf16 %v47_v1, %v46_v0  ;;  %v63_v4 = vld [vmem:[%s480_s1 + $0xf8] sm:$0xff]  ;;  %v45_v13 = vld [vmem:[%s480_s1 + $0x68] sm:$0xff] }
   0x3   :  { %v78_v5 = vld [vmem:[%s480_s1 + $0x170] sm:$0xff]  ;;  %v79_v6 = vld [vmem:[%s480_s1 + $0x178] sm:$0xff]  ;;  %v111_v7 = vpack.c.bf16 %v63_v4, %v62_v2  ;;  %v60_v14 = vld [vmem:[%s480_s1 + $0xe0] sm:$0xff]  ;;  %v102_v16 = vpack.c.bf16 %v45_v13, %v44_v11 }
   0x4   :  { %v119_v8 = vpack.c.bf16 %v79_v6, %v78_v5  ;;  %v94_v9 = vld [vmem:[%s480_s1 + $0x1f0] sm:$0xff]  ;;  %v95_v10 = vld [vmem:[%s480_s1 + $0x1f8] sm:$0xff]  ;;  %128 = vmatpush.bf16.msra.mxu0 %v103_v3  ;;  %v61_v15 = vld [vmem:[%s480_s1 + $0xe8] sm:$0xff] }
   0x5   :  { %v127_v12 = vpack.c.bf16 %v95_v10, %v94_v9  ;;  %142 = vmatpush.bf16.msra.mxu1 %v111_v7  ;;  %v110_v17 = vpack.c.bf16 %v61_v15, %v60_v14  ;;  %v76_v18 = vld [vmem:[%s480_s1 + $0x160] sm:$0xff]  ;;  %v77_v19 = vld [vmem:[%s480_s1 + $0x168] sm:$0xff]  ;;  %v42_v23 = vld [vmem:[%s480_s1 + $0x50] sm:$0xff] }
   0x6   :  { %156 = vmatpush.bf16.msra.mxu2 %v119_v8  ;;  %v92_v20 = vld [vmem:[%s480_s1 + $0x1e0] sm:$0xff]  ;;  %v118_v21 = vpack.c.bf16 %v77_v19, %v76_v18  ;;  %v93_v22 = vld [vmem:[%s480_s1 + $0x1e8] sm:$0xff]  ;;  %v43_v24 = vld [vmem:[%s480_s1 + $0x58] sm:$0xff] }
   0x7   :  { %170 = vmatpush.bf16.msra.mxu3 %v127_v12  ;;  %v126_v25 = vpack.c.bf16 %v93_v22, %v92_v20  ;;  %v58_v26 = vld [vmem:[%s480_s1 + $0xd0] sm:$0xff]  ;;  %v59_v27 = vld [vmem:[%s480_s1 + $0xd8] sm:$0xff]  ;;  %v101_v29 = vpack.c.bf16 %v43_v24, %v42_v23  ;;  %v40_v35 = vld [vmem:[%s480_s1 + $0x40] sm:$0xff] }
   0x8   :  { %v74_v28 = vld [vmem:[%s480_s1 + $0x150] sm:$0xff]  ;;  %129 = vmatpush.bf16.msra.mxu0 %v102_v16  ;;  %v75_v30 = vld [vmem:[%s480_s1 + $0x158] sm:$0xff]  ;;  %v109_v33 = vpack.c.bf16 %v59_v27, %v58_v26  ;;  %v41_v36 = vld [vmem:[%s480_s1 + $0x48] sm:$0xff] }
   0x9   :  { %v90_v31 = vld [vmem:[%s480_s1 + $0x1d0] sm:$0xff]  ;;  %v91_v32 = vld [vmem:[%s480_s1 + $0x1d8] sm:$0xff]  ;;  %143 = vmatpush.bf16.msra.mxu1 %v110_v17  ;;  %v117_v34 = vpack.c.bf16 %v75_v30, %v74_v28  ;;  %v56_v37 = vld [vmem:[%s480_s1 + $0xc0] sm:$0xff]  ;;  %v100_v44 = vpack.c.bf16 %v41_v36, %v40_v35 }
   0xa   :  { %157 = vmatpush.bf16.msra.mxu2 %v118_v21  ;;  %v125_v38 = vpack.c.bf16 %v91_v32, %v90_v31  ;;  %v57_v39 = vld [vmem:[%s480_s1 + $0xc8] sm:$0xff]  ;;  %v72_v40 = vld [vmem:[%s480_s1 + $0x140] sm:$0xff]  ;;  %v38_v47 = vld [vmem:[%s480_s1 + $0x30] sm:$0xff] }
   0xb   :  { %171 = vmatpush.bf16.msra.mxu3 %v126_v25  ;;  %v73_v41 = vld [vmem:[%s480_s1 + $0x148] sm:$0xff]  ;;  %v88_v42 = vld [vmem:[%s480_s1 + $0x1c0] sm:$0xff]  ;;  %v108_v45 = vpack.c.bf16 %v57_v39, %v56_v37  ;;  %v39_v48 = vld [vmem:[%s480_s1 + $0x38] sm:$0xff] }
   0xc   :  { %v89_v43 = vld [vmem:[%s480_s1 + $0x1c8] sm:$0xff]  ;;  %130 = vmatpush.bf16.msra.mxu0 %v101_v29  ;;  %v116_v46 = vpack.c.bf16 %v73_v41, %v72_v40  ;;  %v54_v49 = vld [vmem:[%s480_s1 + $0xb0] sm:$0xff]  ;;  %v55_v51 = vld [vmem:[%s480_s1 + $0xb8] sm:$0xff]  ;;  %v99_v56 = vpack.c.bf16 %v39_v48, %v38_v47 }
   0xd   :  { %144 = vmatpush.bf16.msra.mxu1 %v109_v33  ;;  %v124_v50 = vpack.c.bf16 %v89_v43, %v88_v42  ;;  %v70_v52 = vld [vmem:[%s480_s1 + $0x130] sm:$0xff]  ;;  %v71_v53 = vld [vmem:[%s480_s1 + $0x138] sm:$0xff]  ;;  %v107_v57 = vpack.c.bf16 %v55_v51, %v54_v49  ;;  %v36_v59 = vld [vmem:[%s480_s1 + $0x20] sm:$0xff] }
   0xe   :  { %158 = vmatpush.bf16.msra.mxu2 %v117_v34  ;;  %v86_v54 = vld [vmem:[%s480_s1 + $0x1b0] sm:$0xff]  ;;  %v87_v55 = vld [vmem:[%s480_s1 + $0x1b8] sm:$0xff]  ;;  %v115_v58 = vpack.c.bf16 %v71_v53, %v70_v52  ;;  %v37_v60 = vld [vmem:[%s480_s1 + $0x28] sm:$0xff] }
   0xf   :  { %172 = vmatpush.bf16.msra.mxu3 %v125_v38  ;;  %v52_v61 = vld [vmem:[%s480_s1 + $0xa0] sm:$0xff]  ;;  %v123_v62 = vpack.c.bf16 %v87_v55, %v86_v54  ;;  %v53_v63 = vld [vmem:[%s480_s1 + $0xa8] sm:$0xff]  ;;  %v98_v4 = vpack.c.bf16 %v37_v60, %v36_v59  ;;  %v34_v7 = vld [vmem:[%s480_s1 + $0x10] sm:$0xff] }
  0x10   :  { %131 = vmatpush.bf16.msra.mxu0 %v100_v44  ;;  %v68_v0 = vld [vmem:[%s480_s1 + $0x120] sm:$0xff]  ;;  %v69_v1 = vld [vmem:[%s480_s1 + $0x128] sm:$0xff]  ;;  %v106_v5 = vpack.c.bf16 %v53_v63, %v52_v61  ;;  %v35_v8 = vld [vmem:[%s480_s1 + $0x18] sm:$0xff] }
  0x11   :  { %145 = vmatpush.bf16.msra.mxu1 %v108_v45  ;;  %v84_v2 = vld [vmem:[%s480_s1 + $0x1a0] sm:$0xff]  ;;  %v85_v3 = vld [vmem:[%s480_s1 + $0x1a8] sm:$0xff]  ;;  %v114_v6 = vpack.c.bf16 %v69_v1, %v68_v0  ;;  %v50_v9 = vld [vmem:[%s480_s1 + $0x90] sm:$0xff]  ;;  %v97_v16 = vpack.c.bf16 %v35_v8, %v34_v7 }
  0x12   :  { %159 = vmatpush.bf16.msra.mxu2 %v116_v46  ;;  %v122_v10 = vpack.c.bf16 %v85_v3, %v84_v2  ;;  %v51_v11 = vld [vmem:[%s480_s1 + $0x98] sm:$0xff]  ;;  %v66_v12 = vld [vmem:[%s480_s1 + $0x110] sm:$0xff]  ;;  %v32_v17 = vld [vmem:[%s480_s1] sm:$0xff] }
  0x13   :  { %173 = vmatpush.bf16.msra.mxu3 %v124_v50  ;;  %v67_v13 = vld [vmem:[%s480_s1 + $0x118] sm:$0xff]  ;;  %v82_v14 = vld [vmem:[%s480_s1 + $0x190] sm:$0xff]  ;;  %v105_v18 = vpack.c.bf16 %v51_v11, %v50_v9  ;;  %v33_v20 = vld [vmem:[%s480_s1 + $0x8] sm:$0xff] }
  0x14   :  { %132 = vmatpush.bf16.msra.mxu0 %v99_v56  ;;  %v83_v15 = vld [vmem:[%s480_s1 + $0x198] sm:$0xff]  ;;  %v113_v19 = vpack.c.bf16 %v67_v13, %v66_v12  ;;  %v48_v21 = vld [vmem:[%s480_s1 + $0x80] sm:$0xff] }
  0x15   :  { %146 = vmatpush.bf16.msra.mxu1 %v107_v57 }
  0x16   :  { %160 = vmatpush.bf16.msra.mxu2 %v115_v58 }
  0x17   :  { %174 = vmatpush.bf16.msra.mxu3 %v123_v62 }
  0x18   :  { %133 = vmatpush.bf16.msra.mxu0 %v98_v4 }
  0x19   :  { %147 = vmatpush.bf16.msra.mxu1 %v106_v5 }
  0x1a   :  { %161 = vmatpush.bf16.msra.mxu2 %v114_v6 }
  0x1b   :  { %7 = vsyncpa [#allocation4], 0  ;;  %175 = vmatpush.bf16.msra.mxu3 %v122_v10  ;;  %v121_v22 = vpack.c.bf16 %v83_v15, %v82_v14  ;;  %v49_v23 = vld [vmem:[%s480_s1 + $0x88] sm:$0xff]  ;;  %v64_v24 = vld [vmem:[%s480_s1 + $0x100] sm:$0xff]  ;;  %v96_v28 = vpack.c.bf16 %v33_v20, %v32_v17  ;;  %s201_s15 = sshll.u32 %s481_s2, 4  ;;  %s243_s16 = smov 128   ;;  %s202_s15 = int_to_ptr.hbm [resolvable:$true] %s201_s15 }
  0x1c   :  { %v65_v25 = vld [vmem:[%s480_s1 + $0x108] sm:$0xff]  ;;  %v80_v26 = vld [vmem:[%s480_s1 + $0x180] sm:$0xff]  ;;  %134 = vmatpush.bf16.msra.mxu0 %v97_v16  ;;  %v104_v32 = vpack.c.bf16 %v49_v23, %v48_v21  ;;  %v22_v35 = vld [vmem:[%s479_s0 + $0x10] sm:$0xff]  ;;  %s244_s17 = smov 8  }
  0x1d   :  { %v81_v27 = vld [vmem:[%s480_s1 + $0x188] sm:$0xff]  ;;  %v20_v29 = vld [vmem:[%s479_s0] sm:$0xff]  ;;  %148 = vmatpush.bf16.msra.mxu1 %v105_v18  ;;  %v112_v33 = vpack.c.bf16 %v65_v25, %v64_v24  ;;  %v26_v36 = vld [vmem:[%s479_s0 + $0x30] sm:$0xff] }
  0x1e   :  { %v24_v30 = vld [vmem:[%s479_s0 + $0x20] sm:$0xff]  ;;  %v21_v31 = vld [vmem:[%s479_s0 + $0x8] sm:$0xff]  ;;  %162 = vmatpush.bf16.msra.mxu2 %v113_v19  ;;  %v120_v37 = vpack.c.bf16 %v81_v27, %v80_v26  ;;  %v23_v38 = vld [vmem:[%s479_s0 + $0x18] sm:$0xff]  ;;  %v30_v42 = vpack.c.bf16 %v26_v36, %v22_v35 }
  0x1f   :  { %v25_v34 = vld [vmem:[%s479_s0 + $0x28] sm:$0xff]  ;;  %176 = vmatpush.bf16.msra.mxu3 %v121_v22  ;;  %v27_v39 = vld [vmem:[%s479_s0 + $0x38] sm:$0xff]  ;;  %v28_v40 = vpack.c.bf16 %v24_v30, %v20_v29  ;;  %s242_s0 = smov [#allocation3]  }
  0x20   :  { %135 = vmatpush.bf16.msra.mxu0 %v96_v28  ;;  %v29_v41 = vpack.c.bf16 %v25_v34, %v21_v31  ;;  %v31_v43 = vpack.c.bf16 %v27_v39, %v23_v38  ;;  %s199_s12 = sshll.u32 %s242_s0, 4  ;;  %s200_s12 = int_to_ptr.vmem [resolvable:$true] %s199_s12 }
  0x21   :  { %149 = vmatpush.bf16.msra.mxu1 %v104_v32 }
  0x22   :  { %163 = vmatpush.bf16.msra.mxu2 %v112_v33 }
  0x23   :  { %177 = vmatpush.bf16.msra.mxu3 %v120_v37  ;;  %136 = vmatmul.bf16.vlgmr.msra.gmra.mxu0 %v28_v40 }
  0x24   :  { %150 = vmatmul.bf16.vlgmr.msra.gmra.mxu1 %v29_v41 }
  0x25   :  { %164 = vmatmul.bf16.vlgmr.msra.gmra.mxu2 %v30_v42 }
  0x26   :  { %178 = vmatmul.bf16.vlgmr.msra.gmra.mxu3 %v31_v43 }
  0xa0   :  { %v137_v44 = vpop.f32.mrf.mxu0 }
  0xa1   :  { %v151_v45 = vpop.f32.mrf.mxu1 }
  0xa2   :  { %v152_v46 = vadd.f32 %v151_v45, %v137_v44 }
  0xa8   :  { %v165_v47 = vpop.f32.mrf.mxu2  ;;  %v139_v51 = vpop.f32.mrf.mxu0 }
  0xa9   :  { %v166_v48 = vadd.f32 %v165_v47, %v152_v46  ;;  %v179_v49 = vpop.f32.mrf.mxu3  ;;  %v153_v52 = vpop.f32.mrf.mxu1 }
  0xaa   :  { %v154_v53 = vadd.f32 %v153_v52, %v139_v51 }
  0xab   :  { %v180_v50 = vadd.f32 %v179_v49, %v166_v48 }
  0xad   :  { %193 = vst [vmem:[#allocation3] sm:$0xff] %v180_v50 }
  0xb0   :  { %v167_v54 = vpop.f32.mrf.mxu2 }
  0xb1   :  { %v168_v55 = vadd.f32 %v167_v54, %v154_v53  ;;  %v181_v56 = vpop.f32.mrf.mxu3 }
  0xb3   :  { %v182_v57 = vadd.f32 %v181_v56, %v168_v55 }
  0xb5   :  { %194 = vst [vmem:[#allocation3 + $0x8] sm:$0xff] %v182_v57 }
  0xb6   :  { %207 = dma.vmem_to_hbm [thread:$0]  %s200_s12, 256, %s202_s15, [#allocation4], %s243_s16, %s243_s16, %s244_s17  }
  0xb7   :  { %240 = dma.done.wait [#allocation4], 256  }
  0xb8   :  { %241 = vsyncadd [#allocation4], 4294967040 }
  0xb9   :  { %212 = vsyncpa [#allocation4], 1 }

// kernel: attention_forward.3
= control target key start
LH: loop header
LB: loop body
LE: loop exit
PB: predicated region body
PF: predicated region fallthrough
CT: control target
= control target key end

     0   :  { %s885_s15 = smov 0   ;;  %s887_s16 = smov 0   ;;  %s1186_s0 = inlined_call_operand.vmem [shape: f32[16,128], index: 0, kind: input, shape index: {}]   ;;  %s1187_s1 = inlined_call_operand.vmem [shape: f32[1,128], index: 1, kind: input, shape index: {}]   ;;  %s1188_s2 = inlined_call_operand.vmem [shape: f32[1,128], index: 2, kind: input, shape index: {}]   ;;  %s1189_s3 = inlined_call_operand.vmem [shape: f32[128,1536], index: 3, kind: input, shape index: {}]   ;;  %s1190_s4 = inlined_call_operand.vmem [shape: f32[16,1536], index: 4, kind: output, shape index: {}]  }
   0x1   :  { %s889_s17 = smov 0   ;;  %s891_s18 = smov 0  }
   0x2   :  { %s893_s19 = smov 0  }
   0x3 LB: > { %s23_s20 = sadd.s32 1, %s853_s18  ;;  %s741_s21 = sadd.s32 4294967295, %s857_s19   ;;  %s857_s19 = sphi %s893_s19, %s14_s19   ;;  %s853_s18 = sphi %s891_s18, %s1195_s18   ;;  %s849_s17 = sphi %s889_s17, %s1194_s17   ;;  %s845_s16 = sphi %s887_s16, %s1193_s16   ;;  %s841_s15 = sphi %s885_s15, %s1192_s15  }
   0x4   : > { %p24_p0 = scmp.ge.s32.totalorder %s23_s20, 3  ;;  %p108_p1 = scmp.ne.s32.totalorder %s845_s16, %s841_s15 }
   0x5   : > { %p109_p2 = scmp.eq.s32.totalorder %s857_s19, 0  ;;  %p140_p4 = scmp.eq.s32.totalorder %s741_s21, 2 }
   0x6   : > { %s1197_s20 = smov (%p24_p0, %s23_s20), 0  ;;  %s101_s23 = sadd.s32 1, %s845_s16 }
   0x7   : > { %p110_p3 = por %p109_p2, %p108_p1  ;;  %s98_s22 = ssub.s32 %s853_s18, %s1197_s20 }
   0x8   : > { %p99_p5 = scmp.eq.s32.totalorder %s98_s22, 0  ;;  %p920_p6 = por %p140_p4, %p108_p1 }
   0x9   : > { %p745_p7 = scmp.ge.s32.totalorder %s857_s19, 3 }
   0xa   : > { %s925_s25 = scalar_select %p99_p5, %s845_s16, %s101_s23  }
   0xb   : > { %177 = sbr.rel (%p745_p7) target bundleno = 84 (0x54), region = 28 }
  0x10   : > { %180 = sbr.rel (!%p110_p3) target bundleno = 84 (0x54), region = 32  ;;  %s182_s26 = sand.u32 (%p110_p3), 1, %s845_s16  }
  0x11   : > { %s762_s27 = sshll.u32 (%p110_p3), %s853_s18, 5  ;;  %s746_s28 = sshll.u32 (%p110_p3), %s182_s26, 9 }
  0x12   : > { %s933_s5 = scalar_lea.vmem (%p110_p3), %s1189_s3, %s762_s27  ;;  %s938_s6 = scalar_lea.vmem (%p110_p3), [#allocation3], %s746_s28 }
  0x13   : > { %v200_v0 = vld [vmem:[%s933_s5] sm:$0xff] (%p110_p3)  ;;  %v202_v1 = vld [vmem:[%s933_s5 + $0x8] sm:$0xff] (%p110_p3)  ;;  %v204_v2 = vld [vmem:[%s933_s5 + $0x10] sm:$0xff] (%p110_p3) }
  0x14   : > { %201 = vst [vmem:[%s938_s6] sm:$0xff] (%p110_p3), %v200_v0  ;;  %v206_v3 = vld [vmem:[%s933_s5 + $0x18] sm:$0xff] (%p110_p3)  ;;  %v208_v4 = vld [vmem:[%s933_s5 + $0x60] sm:$0xff] (%p110_p3)  ;;  %v210_v5 = vld [vmem:[%s933_s5 + $0x68] sm:$0xff] (%p110_p3) }
  0x15   : > { %203 = vst [vmem:[%s938_s6 + $0x8] sm:$0xff] %v202_v1  ;;  %v212_v6 = vld [vmem:[%s933_s5 + $0x70] sm:$0xff]  ;;  %v214_v7 = vld [vmem:[%s933_s5 + $0x78] sm:$0xff]  ;;  %v216_v8 = vld [vmem:[%s933_s5 + $0xc0] sm:$0xff] }
  0x16   : > { %205 = vst [vmem:[%s938_s6 + $0x10] sm:$0xff] %v204_v2  ;;  %v218_v9 = vld [vmem:[%s933_s5 + $0xc8] sm:$0xff]  ;;  %v220_v10 = vld [vmem:[%s933_s5 + $0xd0] sm:$0xff]  ;;  %v222_v11 = vld [vmem:[%s933_s5 + $0xd8] sm:$0xff] }
  0x17   : > { %207 = vst [vmem:[%s938_s6 + $0x18] sm:$0xff] %v206_v3  ;;  %v224_v12 = vld [vmem:[%s933_s5 + $0x120] sm:$0xff]  ;;  %v226_v13 = vld [vmem:[%s933_s5 + $0x128] sm:$0xff]  ;;  %v228_v14 = vld [vmem:[%s933_s5 + $0x130] sm:$0xff] }
  0x18   : > { %209 = vst [vmem:[%s938_s6 + $0x20] sm:$0xff] %v208_v4  ;;  %v230_v15 = vld [vmem:[%s933_s5 + $0x138] sm:$0xff]  ;;  %v232_v16 = vld [vmem:[%s933_s5 + $0x180] sm:$0xff]  ;;  %v234_v17 = vld [vmem:[%s933_s5 + $0x188] sm:$0xff] }
  0x19   : > { %211 = vst [vmem:[%s938_s6 + $0x28] sm:$0xff] %v210_v5  ;;  %v236_v18 = vld [vmem:[%s933_s5 + $0x190] sm:$0xff]  ;;  %v238_v19 = vld [vmem:[%s933_s5 + $0x198] sm:$0xff]  ;;  %v240_v20 = vld [vmem:[%s933_s5 + $0x1e0] sm:$0xff] }
  0x1a   : > { %213 = vst [vmem:[%s938_s6 + $0x30] sm:$0xff] %v212_v6  ;;  %v242_v21 = vld [vmem:[%s933_s5 + $0x1e8] sm:$0xff]  ;;  %v244_v22 = vld [vmem:[%s933_s5 + $0x1f0] sm:$0xff]  ;;  %v246_v23 = vld [vmem:[%s933_s5 + $0x1f8] sm:$0xff] }
  0x1b   : > { %215 = vst [vmem:[%s938_s6 + $0x38] sm:$0xff] %v214_v7  ;;  %v248_v24 = vld [vmem:[%s933_s5 + $0x240] sm:$0xff]  ;;  %v250_v25 = vld [vmem:[%s933_s5 + $0x248] sm:$0xff]  ;;  %v252_v26 = vld [vmem:[%s933_s5 + $0x250] sm:$0xff] }
  0x1c   : > { %217 = vst [vmem:[%s938_s6 + $0x40] sm:$0xff] %v216_v8  ;;  %v254_v27 = vld [vmem:[%s933_s5 + $0x258] sm:$0xff]  ;;  %v256_v28 = vld [vmem:[%s933_s5 + $0x2a0] sm:$0xff]  ;;  %v258_v29 = vld [vmem:[%s933_s5 + $0x2a8] sm:$0xff] }
  0x1d   : > { %219 = vst [vmem:[%s938_s6 + $0x48] sm:$0xff] %v218_v9  ;;  %v260_v30 = vld [vmem:[%s933_s5 + $0x2b0] sm:$0xff]  ;;  %v262_v31 = vld [vmem:[%s933_s5 + $0x2b8] sm:$0xff]  ;;  %v264_v32 = vld [vmem:[%s933_s5 + $0x300] sm:$0xff] }
  0x1e   : > { %221 = vst [vmem:[%s938_s6 + $0x50] sm:$0xff] %v220_v10  ;;  %v266_v33 = vld [vmem:[%s933_s5 + $0x308] sm:$0xff]  ;;  %v268_v34 = vld [vmem:[%s933_s5 + $0x310] sm:$0xff]  ;;  %v270_v35 = vld [vmem:[%s933_s5 + $0x318] sm:$0xff] }
  0x1f   : > { %223 = vst [vmem:[%s938_s6 + $0x58] sm:$0xff] %v222_v11  ;;  %v272_v36 = vld [vmem:[%s933_s5 + $0x360] sm:$0xff]  ;;  %v274_v37 = vld [vmem:[%s933_s5 + $0x368] sm:$0xff]  ;;  %v276_v38 = vld [vmem:[%s933_s5 + $0x370] sm:$0xff] }
  0x20   : > { %225 = vst [vmem:[%s938_s6 + $0x60] sm:$0xff] %v224_v12  ;;  %v278_v39 = vld [vmem:[%s933_s5 + $0x378] sm:$0xff]  ;;  %v280_v40 = vld [vmem:[%s933_s5 + $0x3c0] sm:$0xff]  ;;  %v282_v41 = vld [vmem:[%s933_s5 + $0x3c8] sm:$0xff] }
  0x21   : > { %227 = vst [vmem:[%s938_s6 + $0x68] sm:$0xff] %v226_v13  ;;  %v284_v42 = vld [vmem:[%s933_s5 + $0x3d0] sm:$0xff]  ;;  %v286_v43 = vld [vmem:[%s933_s5 + $0x3d8] sm:$0xff]  ;;  %v288_v44 = vld [vmem:[%s933_s5 + $0x420] sm:$0xff] }
  0x22   : > { %229 = vst [vmem:[%s938_s6 + $0x70] sm:$0xff] %v228_v14  ;;  %v290_v45 = vld [vmem:[%s933_s5 + $0x428] sm:$0xff]  ;;  %v292_v46 = vld [vmem:[%s933_s5 + $0x430] sm:$0xff]  ;;  %v294_v47 = vld [vmem:[%s933_s5 + $0x438] sm:$0xff] }
  0x23   : > { %231 = vst [vmem:[%s938_s6 + $0x78] sm:$0xff] %v230_v15  ;;  %v296_v48 = vld [vmem:[%s933_s5 + $0x480] sm:$0xff]  ;;  %v298_v49 = vld [vmem:[%s933_s5 + $0x488] sm:$0xff]  ;;  %v300_v50 = vld [vmem:[%s933_s5 + $0x490] sm:$0xff] }
  0x24   : > { %233 = vst [vmem:[%s938_s6 + $0x80] sm:$0xff] %v232_v16  ;;  %v302_v51 = vld [vmem:[%s933_s5 + $0x498] sm:$0xff]  ;;  %v304_v52 = vld [vmem:[%s933_s5 + $0x4e0] sm:$0xff]  ;;  %v306_v53 = vld [vmem:[%s933_s5 + $0x4e8] sm:$0xff] }
  0x25   : > { %235 = vst [vmem:[%s938_s6 + $0x88] sm:$0xff] %v234_v17  ;;  %v308_v54 = vld [vmem:[%s933_s5 + $0x4f0] sm:$0xff]  ;;  %v310_v55 = vld [vmem:[%s933_s5 + $0x4f8] sm:$0xff]  ;;  %v312_v56 = vld [vmem:[%s933_s5 + $0x540] sm:$0xff] }
  0x26   : > { %237 = vst [vmem:[%s938_s6 + $0x90] sm:$0xff] %v236_v18  ;;  %v314_v57 = vld [vmem:[%s933_s5 + $0x548] sm:$0xff]  ;;  %v316_v58 = vld [vmem:[%s933_s5 + $0x550] sm:$0xff]  ;;  %v318_v59 = vld [vmem:[%s933_s5 + $0x558] sm:$0xff] }
  0x27   : > { %239 = vst [vmem:[%s938_s6 + $0x98] sm:$0xff] %v238_v19  ;;  %v320_v60 = vld [vmem:[%s933_s5 + $0x5a0] sm:$0xff]  ;;  %v322_v61 = vld [vmem:[%s933_s5 + $0x5a8] sm:$0xff]  ;;  %v324_v62 = vld [vmem:[%s933_s5 + $0x5b0] sm:$0xff] }
  0x28   : > { %241 = vst [vmem:[%s938_s6 + $0xa0] sm:$0xff] %v240_v20  ;;  %v326_v63 = vld [vmem:[%s933_s5 + $0x5b8] sm:$0xff] }
  0x29   : > { %243 = vst [vmem:[%s938_s6 + $0xa8] sm:$0xff] %v242_v21 }
  0x2a   : > { %245 = vst [vmem:[%s938_s6 + $0xb0] sm:$0xff] %v244_v22 }
  0x2b   : > { %247 = vst [vmem:[%s938_s6 + $0xb8] sm:$0xff] %v246_v23 }
  0x2c   : > { %249 = vst [vmem:[%s938_s6 + $0xc0] sm:$0xff] %v248_v24 }
  0x2d   : > { %251 = vst [vmem:[%s938_s6 + $0xc8] sm:$0xff] %v250_v25 }
  0x2e   : > { %253 = vst [vmem:[%s938_s6 + $0xd0] sm:$0xff] %v252_v26 }
  0x2f   : > { %255 = vst [vmem:[%s938_s6 + $0xd8] sm:$0xff] %v254_v27 }
  0x30   : > { %257 = vst [vmem:[%s938_s6 + $0xe0] sm:$0xff] %v256_v28 }
  0x31   : > { %259 = vst [vmem:[%s938_s6 + $0xe8] sm:$0xff] %v258_v29 }
  0x32   : > { %261 = vst [vmem:[%s938_s6 + $0xf0] sm:$0xff] %v260_v30 }
  0x33   : > { %263 = vst [vmem:[%s938_s6 + $0xf8] sm:$0xff] %v262_v31 }
  0x34   : > { %265 = vst [vmem:[%s938_s6 + $0x100] sm:$0xff] %v264_v32 }
  0x35   : > { %267 = vst [vmem:[%s938_s6 + $0x108] sm:$0xff] %v266_v33 }
  0x36   : > { %269 = vst [vmem:[%s938_s6 + $0x110] sm:$0xff] %v268_v34 }
  0x37   : > { %271 = vst [vmem:[%s938_s6 + $0x118] sm:$0xff] %v270_v35 }
  0x38   : > { %273 = vst [vmem:[%s938_s6 + $0x120] sm:$0xff] %v272_v36 }
  0x39   : > { %275 = vst [vmem:[%s938_s6 + $0x128] sm:$0xff] %v274_v37 }
  0x3a   : > { %277 = vst [vmem:[%s938_s6 + $0x130] sm:$0xff] %v276_v38 }
  0x3b   : > { %279 = vst [vmem:[%s938_s6 + $0x138] sm:$0xff] %v278_v39 }
  0x3c   : > { %281 = vst [vmem:[%s938_s6 + $0x140] sm:$0xff] %v280_v40 }
  0x3d   : > { %283 = vst [vmem:[%s938_s6 + $0x148] sm:$0xff] %v282_v41 }
  0x3e   : > { %285 = vst [vmem:[%s938_s6 + $0x150] sm:$0xff] %v284_v42 }
  0x3f   : > { %287 = vst [vmem:[%s938_s6 + $0x158] sm:$0xff] %v286_v43 }
  0x40   : > { %289 = vst [vmem:[%s938_s6 + $0x160] sm:$0xff] %v288_v44 }
  0x41   : > { %291 = vst [vmem:[%s938_s6 + $0x168] sm:$0xff] %v290_v45 }
  0x42   : > { %293 = vst [vmem:[%s938_s6 + $0x170] sm:$0xff] %v292_v46 }
  0x43   : > { %295 = vst [vmem:[%s938_s6 + $0x178] sm:$0xff] %v294_v47 }
  0x44   : > { %297 = vst [vmem:[%s938_s6 + $0x180] sm:$0xff] %v296_v48 }
  0x45   : > { %299 = vst [vmem:[%s938_s6 + $0x188] sm:$0xff] %v298_v49 }
  0x46   : > { %301 = vst [vmem:[%s938_s6 + $0x190] sm:$0xff] %v300_v50 }
  0x47   : > { %303 = vst [vmem:[%s938_s6 + $0x198] sm:$0xff] %v302_v51 }
  0x48   : > { %305 = vst [vmem:[%s938_s6 + $0x1a0] sm:$0xff] %v304_v52 }
  0x49   : > { %307 = vst [vmem:[%s938_s6 + $0x1a8] sm:$0xff] %v306_v53 }
  0x4a   : > { %309 = vst [vmem:[%s938_s6 + $0x1b0] sm:$0xff] %v308_v54 }
  0x4b   : > { %311 = vst [vmem:[%s938_s6 + $0x1b8] sm:$0xff] %v310_v55 }
  0x4c   : > { %313 = vst [vmem:[%s938_s6 + $0x1c0] sm:$0xff] %v312_v56 }
  0x4d   : > { %315 = vst [vmem:[%s938_s6 + $0x1c8] sm:$0xff] %v314_v57 }
  0x4e   : > { %317 = vst [vmem:[%s938_s6 + $0x1d0] sm:$0xff] %v316_v58 }
  0x4f   : > { %319 = vst [vmem:[%s938_s6 + $0x1d8] sm:$0xff] %v318_v59 }
  0x50   : > { %321 = vst [vmem:[%s938_s6 + $0x1e0] sm:$0xff] %v320_v60 }
  0x51   : > { %323 = vst [vmem:[%s938_s6 + $0x1e8] sm:$0xff] %v322_v61 }
  0x52   : > { %325 = vst [vmem:[%s938_s6 + $0x1f0] sm:$0xff] %v324_v62 }
  0x53   : > { %327 = vst [vmem:[%s938_s6 + $0x1f8] sm:$0xff] %v326_v63 }
  0x54 PF: > { %p749_p8 = scmp.ge.s32.totalorder %s857_s19, 1  ;;  %p332_p9 = scmp.lt.s32.totalorder %s857_s19, 4 }
  0x56   : > { %p333_p10 = pnand %p749_p8, %p332_p9 }
  0x57   : > { %s339_s7 = sand.u32 (!%p333_p10), 1, %s841_s15   ;;  %p752_p11 = scmp.ne.s32.totalorder (!%p333_p10), %s849_s17, 0 }
  0x58   : > { %336 = sbr.rel (%p333_p10) target bundleno = 562 (0x232), region = 55  ;;  %s750_s8 = sshll.u32 (!%p333_p10), %s339_s7, 9 }
  0x59   : > { %s751_s9 = sshll.u32 (!%p333_p10), %s339_s7, 6  ;;  %s1068_s10 = scalar_lea.vmem (!%p333_p10), [#allocation3], %s750_s8 }
  0x5a   : > { %s1070_s11 = scalar_lea.vmem (!%p333_p10), [#allocation4], %s751_s9 }
  0x5d   : > { %380 = sbr.rel (%p752_p11) target bundleno = 376 (0x178), region = 63 }
  0x62   : > { %v381_v0 = vld [vmem:[%s1186_s0] sm:$0xff]  ;;  %v382_v1 = vld [vmem:[%s1186_s0 + $0x8] sm:$0xff]  ;;  %v859_v2 = vmov 128.0  }
  0x63   : > { %383 = vadd.xlane.f32.xlu0 %v381_v0  ;;  %813 = vrcp.f32 %v859_v2  ;;  %v811_v35 = vld [vmem:[%s1187_s1] ss:$0 sm:$0xff] }
  0x64   : > { %v812_v39 = vld [vmem:[%s1188_s2] ss:$0 sm:$0xff] }
  0x69   : > { %v814_v3 = vpop.eup %813 }
  0x6a   : > { %v388_v4 = vmul.f32 128.0, %v814_v3  ;;  %vm392_vm0 = vweird.f32 %v814_v3 }
  0x6b   : > { %385 = vadd.xlane.f32.xlu0 %v382_v1 }
  0x6c   : > { %v389_v5 = vsub.f32 1.0, %v388_v4 }
  0x6e   : > { %v390_v6 = vmul.f32 %v814_v3, %v389_v5 }
  0x70   : > { %v391_v7 = vadd.f32 %v814_v3, %v390_v6 }
  0x72   : > { %v393_v8 = vsel %vm392_vm0, %v814_v3, %v391_v7 }
  0xd6   : > { %v384_v9 = vpop.xlane.xlu0 %383 }
  0xd7   : > { %v394_v10 = vmul.f32 %v393_v8, %v384_v9 }
  0xd9   : > { %v396_v11 = vsub.f32 %v381_v0, %v394_v10 }
  0xdb   : > { %v398_v12 = vmul.f32 %v396_v11, %v396_v11 }
  0xdd   : > { %400 = vadd.xlane.f32.xlu1 %v398_v12 }
  0xde   : > { %v386_v13 = vpop.xlane.xlu0 %385 }
  0xdf   : > { %v395_v14 = vmul.f32 %v393_v8, %v386_v13 }
  0xe1   : > { %v397_v15 = vsub.f32 %v382_v1, %v395_v14 }
  0xe3   : > { %v399_v16 = vmul.f32 %v397_v15, %v397_v15 }
  0xe5   : > { %402 = vadd.xlane.f32.xlu1 %v399_v16 }
 0x150   : > { %v401_v17 = vpop.xlane.xlu1 %400 }
 0x151   : > { %v404_v18 = vmul.f32 %v401_v17, %v393_v8 }
 0x153   : > { %v406_v19 = vadd.f32 1e-05, %v404_v18 }
 0x155   : > { %815 = vrsqrt.f32 %v406_v19  ;;  %vm414_vm2 = vweird.f32 %v406_v19 }
 0x158   : > { %v403_v20 = vpop.xlane.xlu1 %402 }
 0x159   : > { %v405_v21 = vmul.f32 %v403_v20, %v393_v8 }
 0x15b   : > { %v816_v22 = vpop.eup %815  ;;  %v407_v23 = vadd.f32 1e-05, %v405_v21 }
 0x15c   : > { %v409_v24 = vmul.f32 %v816_v22, %v406_v19  ;;  %vm415_vm1 = vweird.f32 %v816_v22 }
 0x15d   : > { %817 = vrsqrt.f32 %v407_v23  ;;  %vm416_vm3 = vmor %vm414_vm2, %vm415_vm1  ;;  %vm424_vm5 = vweird.f32 %v407_v23 }
 0x15e   : > { %v410_v25 = vmul.f32 %v816_v22, %v409_v24 }
 0x160   : > { %v411_v26 = vmul.f32 0.5, %v410_v25 }
 0x162   : > { %v412_v27 = vsub.f32 1.5, %v411_v26 }
 0x163   : > { %v818_v28 = vpop.eup %817 }
 0x164   : > { %v413_v29 = vmul.f32 %v816_v22, %v412_v27  ;;  %v419_v30 = vmul.f32 %v818_v28, %v407_v23  ;;  %vm425_vm4 = vweird.f32 %v818_v28 }
 0x165   : > { %vm426_vm6 = vmor %vm424_vm5, %vm425_vm4 }
 0x166   : > { %v420_v31 = vmul.f32 %v818_v28, %v419_v30  ;;  %v417_v32 = vsel %vm416_vm3, %v816_v22, %v413_v29 }
 0x167   : > { %v428_v36 = vmul.f32 %v417_v32, %v396_v11 }
 0x168   : > { %v421_v33 = vmul.f32 0.5, %v420_v31 }
 0x169   : > { %v434_v40 = vmul.f32 %v811_v35, %v428_v36 }
 0x16a   : > { %v422_v34 = vsub.f32 1.5, %v421_v33 }
 0x16b   : > { %v440_v43 = vadd.f32 %v812_v39, %v434_v40 }
 0x16c   : > { %v423_v37 = vmul.f32 %v818_v28, %v422_v34 }
 0x16e   : > { %v427_v38 = vsel %vm426_vm6, %v818_v28, %v423_v37 }
 0x16f   : > { %v429_v41 = vmul.f32 %v427_v38, %v397_v15 }
 0x171   : > { %v435_v42 = vmul.f32 %v811_v35, %v429_v41 }
 0x173   : > { %v441_v44 = vadd.f32 %v812_v39, %v435_v42 }
 0x175   : > { %v768_v45 = vpack.c.bf16 %v441_v44, %v440_v43 }
 0x177   : > { %769 = vst [vmem:[#allocation2] sm:$0xff] %v768_v45  }
 0x178 PF: > { %v504_v46 = vld [vmem:[%s1068_s10 + $0x1c0] sm:$0xff]  ;;  %v505_v48 = vld [vmem:[%s1068_s10 + $0x1c8] sm:$0xff]  ;;  %v506_v51 = vld [vmem:[%s1068_s10 + $0x1d0] sm:$0xff]  ;;  %s764_s27 = sshll.u32 (%p920_p6), %s849_s17, 5 }
 0x179   : > { %v508_v47 = vld [vmem:[%s1068_s10 + $0x1e0] sm:$0xff]  ;;  %v509_v50 = vld [vmem:[%s1068_s10 + $0x1e8] sm:$0xff]  ;;  %v510_v52 = vld [vmem:[%s1068_s10 + $0x1f0] sm:$0xff]  ;;  %s626_s30 = scalar_lea.vmem (%p920_p6), %s1190_s4, %s764_s27 }
 0x17a   : > { %v540_v49 = vpack.c.bf16 %v508_v47, %v504_v46  ;;  %v541_v53 = vpack.c.bf16 %v509_v50, %v505_v48  ;;  %v542_v54 = vpack.c.bf16 %v510_v52, %v506_v51  ;;  %v507_v55 = vld [vmem:[%s1068_s10 + $0x1d8] sm:$0xff]  ;;  %v496_v57 = vld [vmem:[%s1068_s10 + $0x180] sm:$0xff]  ;;  %v497_v60 = vld [vmem:[%s1068_s10 + $0x188] sm:$0xff] }
 0x17b   : > { %v511_v56 = vld [vmem:[%s1068_s10 + $0x1f8] sm:$0xff]  ;;  %v500_v59 = vld [vmem:[%s1068_s10 + $0x1a0] sm:$0xff]  ;;  %v501_v61 = vld [vmem:[%s1068_s10 + $0x1a8] sm:$0xff] }
 0x17c   : > { %550 = vmatpush.bf16.msra.mxu0 %v540_v49  ;;  %v543_v58 = vpack.c.bf16 %v511_v56, %v507_v55  ;;  %564 = vmatpush.bf16.msra.mxu1 %v541_v53  ;;  %v536_v62 = vpack.c.bf16 %v500_v59, %v496_v57  ;;  %v537_v63 = vpack.c.bf16 %v501_v61, %v497_v60  ;;  %v498_v0 = vld [vmem:[%s1068_s10 + $0x190] sm:$0xff]  ;;  %v499_v2 = vld [vmem:[%s1068_s10 + $0x198] sm:$0xff]  ;;  %v488_v5 = vld [vmem:[%s1068_s10 + $0x140] sm:$0xff] }
 0x17d   : > { %578 = vmatpush.bf16.msra.mxu2 %v542_v54  ;;  %v502_v1 = vld [vmem:[%s1068_s10 + $0x1b0] sm:$0xff]  ;;  %v503_v4 = vld [vmem:[%s1068_s10 + $0x1b8] sm:$0xff]  ;;  %v492_v6 = vld [vmem:[%s1068_s10 + $0x160] sm:$0xff] }
 0x17e   : > { %592 = vmatpush.bf16.msra.mxu3 %v543_v58  ;;  %v538_v3 = vpack.c.bf16 %v502_v1, %v498_v0  ;;  %v539_v7 = vpack.c.bf16 %v503_v4, %v499_v2  ;;  %v489_v8 = vld [vmem:[%s1068_s10 + $0x148] sm:$0xff]  ;;  %v490_v10 = vld [vmem:[%s1068_s10 + $0x150] sm:$0xff]  ;;  %v532_v11 = vpack.c.bf16 %v492_v6, %v488_v5  ;;  %v491_v13 = vld [vmem:[%s1068_s10 + $0x158] sm:$0xff] }
 0x17f   : > { %v493_v9 = vld [vmem:[%s1068_s10 + $0x168] sm:$0xff]  ;;  %v494_v12 = vld [vmem:[%s1068_s10 + $0x170] sm:$0xff]  ;;  %v495_v14 = vld [vmem:[%s1068_s10 + $0x178] sm:$0xff] }
 0x180   : > { %551 = vmatpush.bf16.msra.mxu0 %v536_v62  ;;  %565 = vmatpush.bf16.msra.mxu1 %v537_v63  ;;  %v533_v15 = vpack.c.bf16 %v493_v9, %v489_v8  ;;  %v534_v16 = vpack.c.bf16 %v494_v12, %v490_v10  ;;  %v480_v17 = vld [vmem:[%s1068_s10 + $0x100] sm:$0xff]  ;;  %v481_v19 = vld [vmem:[%s1068_s10 + $0x108] sm:$0xff]  ;;  %v535_v20 = vpack.c.bf16 %v495_v14, %v491_v13  ;;  %v482_v22 = vld [vmem:[%s1068_s10 + $0x110] sm:$0xff] }
 0x181   : > { %579 = vmatpush.bf16.msra.mxu2 %v538_v3  ;;  %v484_v18 = vld [vmem:[%s1068_s10 + $0x120] sm:$0xff]  ;;  %v485_v21 = vld [vmem:[%s1068_s10 + $0x128] sm:$0xff]  ;;  %v486_v23 = vld [vmem:[%s1068_s10 + $0x130] sm:$0xff] }
 0x182   : > { %593 = vmatpush.bf16.msra.mxu3 %v539_v7  ;;  %v483_v24 = vld [vmem:[%s1068_s10 + $0x118] sm:$0xff]  ;;  %v528_v26 = vpack.c.bf16 %v484_v18, %v480_v17  ;;  %v529_v27 = vpack.c.bf16 %v485_v21, %v481_v19  ;;  %v530_v28 = vpack.c.bf16 %v486_v23, %v482_v22  ;;  %v472_v29 = vld [vmem:[%s1068_s10 + $0xc0] sm:$0xff]  ;;  %v473_v31 = vld [vmem:[%s1068_s10 + $0xc8] sm:$0xff] }
 0x183   : > { %v487_v25 = vld [vmem:[%s1068_s10 + $0x138] sm:$0xff]  ;;  %v476_v30 = vld [vmem:[%s1068_s10 + $0xe0] sm:$0xff]  ;;  %v477_v33 = vld [vmem:[%s1068_s10 + $0xe8] sm:$0xff] }
 0x184   : > { %552 = vmatpush.bf16.msra.mxu0 %v532_v11  ;;  %566 = vmatpush.bf16.msra.mxu1 %v533_v15  ;;  %v531_v32 = vpack.c.bf16 %v487_v25, %v483_v24  ;;  %v474_v34 = vld [vmem:[%s1068_s10 + $0xd0] sm:$0xff]  ;;  %v475_v36 = vld [vmem:[%s1068_s10 + $0xd8] sm:$0xff]  ;;  %v524_v38 = vpack.c.bf16 %v476_v30, %v472_v29  ;;  %v525_v39 = vpack.c.bf16 %v477_v33, %v473_v31  ;;  %v464_v41 = vld [vmem:[%s1068_s10 + $0x80] sm:$0xff] }
 0x185   : > { %580 = vmatpush.bf16.msra.mxu2 %v534_v16  ;;  %v478_v35 = vld [vmem:[%s1068_s10 + $0xf0] sm:$0xff]  ;;  %v479_v37 = vld [vmem:[%s1068_s10 + $0xf8] sm:$0xff]  ;;  %v468_v42 = vld [vmem:[%s1068_s10 + $0xa0] sm:$0xff] }
 0x186   : > { %594 = vmatpush.bf16.msra.mxu3 %v535_v20  ;;  %v526_v40 = vpack.c.bf16 %v478_v35, %v474_v34  ;;  %v465_v43 = vld [vmem:[%s1068_s10 + $0x88] sm:$0xff]  ;;  %v527_v44 = vpack.c.bf16 %v479_v37, %v475_v36  ;;  %v466_v46 = vld [vmem:[%s1068_s10 + $0x90] sm:$0xff]  ;;  %v467_v48 = vld [vmem:[%s1068_s10 + $0x98] sm:$0xff]  ;;  %v520_v50 = vpack.c.bf16 %v468_v42, %v464_v41 }
 0x187   : > { %v469_v45 = vld [vmem:[%s1068_s10 + $0xa8] sm:$0xff]  ;;  %v470_v47 = vld [vmem:[%s1068_s10 + $0xb0] sm:$0xff]  ;;  %v471_v49 = vld [vmem:[%s1068_s10 + $0xb8] sm:$0xff] }
 0x188   : > { %553 = vmatpush.bf16.msra.mxu0 %v528_v26  ;;  %567 = vmatpush.bf16.msra.mxu1 %v529_v27  ;;  %v521_v51 = vpack.c.bf16 %v469_v45, %v465_v43  ;;  %v522_v52 = vpack.c.bf16 %v470_v47, %v466_v46  ;;  %v456_v53 = vld [vmem:[%s1068_s10 + $0x40] sm:$0xff]  ;;  %v457_v55 = vld [vmem:[%s1068_s10 + $0x48] sm:$0xff]  ;;  %v523_v56 = vpack.c.bf16 %v471_v49, %v467_v48  ;;  %v458_v58 = vld [vmem:[%s1068_s10 + $0x50] sm:$0xff] }
 0x189   : > { %581 = vmatpush.bf16.msra.mxu2 %v530_v28  ;;  %v460_v54 = vld [vmem:[%s1068_s10 + $0x60] sm:$0xff]  ;;  %v461_v57 = vld [vmem:[%s1068_s10 + $0x68] sm:$0xff]  ;;  %v462_v59 = vld [vmem:[%s1068_s10 + $0x70] sm:$0xff] }
 0x18a   : > { %595 = vmatpush.bf16.msra.mxu3 %v531_v32  ;;  %v459_v60 = vld [vmem:[%s1068_s10 + $0x58] sm:$0xff]  ;;  %v516_v62 = vpack.c.bf16 %v460_v54, %v456_v53  ;;  %v517_v63 = vpack.c.bf16 %v461_v57, %v457_v55  ;;  %v518_v0 = vpack.c.bf16 %v462_v59, %v458_v58  ;;  %v448_v1 = vld [vmem:[%s1068_s10] sm:$0xff]  ;;  %v449_v3 = vld [vmem:[%s1068_s10 + $0x8] sm:$0xff] }
 0x18b   : > { %v463_v61 = vld [vmem:[%s1068_s10 + $0x78] sm:$0xff]  ;;  %v452_v2 = vld [vmem:[%s1068_s10 + $0x20] sm:$0xff]  ;;  %v453_v5 = vld [vmem:[%s1068_s10 + $0x28] sm:$0xff] }
 0x18c   : > { %554 = vmatpush.bf16.msra.mxu0 %v524_v38  ;;  %568 = vmatpush.bf16.msra.mxu1 %v525_v39  ;;  %v519_v4 = vpack.c.bf16 %v463_v61, %v459_v60  ;;  %v450_v6 = vld [vmem:[%s1068_s10 + $0x10] sm:$0xff]  ;;  %v451_v8 = vld [vmem:[%s1068_s10 + $0x18] sm:$0xff]  ;;  %v512_v10 = vpack.c.bf16 %v452_v2, %v448_v1  ;;  %v513_v11 = vpack.c.bf16 %v453_v5, %v449_v3 }
 0x18d   : > { %582 = vmatpush.bf16.msra.mxu2 %v526_v40  ;;  %v454_v7 = vld [vmem:[%s1068_s10 + $0x30] sm:$0xff]  ;;  %v455_v9 = vld [vmem:[%s1068_s10 + $0x38] sm:$0xff] }
 0x18e   : > { %596 = vmatpush.bf16.msra.mxu3 %v527_v44  ;;  %v514_v12 = vpack.c.bf16 %v454_v7, %v450_v6  ;;  %v515_v13 = vpack.c.bf16 %v455_v9, %v451_v8  ;;  %v763_v14 = vld [vmem:[#allocation2] sm:$0xff] }
 0x190   : > { %555 = vmatpush.bf16.msra.mxu0 %v520_v50  ;;  %569 = vmatpush.bf16.msra.mxu1 %v521_v51 }
 0x191   : > { %583 = vmatpush.bf16.msra.mxu2 %v522_v52 }
 0x192   : > { %597 = vmatpush.bf16.msra.mxu3 %v523_v56 }
 0x194   : > { %556 = vmatpush.bf16.msra.mxu0 %v516_v62  ;;  %570 = vmatpush.bf16.msra.mxu1 %v517_v63 }
 0x195   : > { %584 = vmatpush.bf16.msra.mxu2 %v518_v0 }
 0x196   : > { %598 = vmatpush.bf16.msra.mxu3 %v519_v4 }
 0x198   : > { %557 = vmatpush.bf16.msra.mxu0 %v512_v10  ;;  %571 = vmatpush.bf16.msra.mxu1 %v513_v11 }
 0x199   : > { %585 = vmatpush.bf16.msra.mxu2 %v514_v12 }
 0x19a   : > { %599 = vmatpush.bf16.msra.mxu3 %v515_v13 }
 0x19b   : > { %558 = vmatmul.bf16.vlgmr.msra.gmra.mxu0 %v763_v14  ;;  %572 = vmatmul.bf16.vlgmr.msra.gmra.mxu1 %v763_v14 }
 0x19c   : > { %586 = vmatmul.bf16.vlgmr.msra.gmra.mxu2 %v763_v14 }
 0x19d   : > { %600 = vmatmul.bf16.vlgmr.msra.gmra.mxu3 %v763_v14 }
 0x218   : > { %v559_v15 = vpop.f32.mrf.mxu0  ;;  %v573_v16 = vpop.f32.mrf.mxu1 }
 0x219   : > { %606 = vst [vmem:[%s1070_s11] sm:$0xff] %v559_v15 }
 0x21a   : > { %607 = vst [vmem:[%s1070_s11 + $0x8] sm:$0xff] %v573_v16 }
 0x21f   : > { %v587_v17 = vpop.f32.mrf.mxu2 }
 0x220   : > { %608 = vst [vmem:[%s1070_s11 + $0x10] sm:$0xff] %v587_v17  ;;  %v601_v18 = vpop.f32.mrf.mxu3  ;;  %v561_v19 = vpop.f32.mrf.mxu0  ;;  %v639_v23 = vld [vmem:[%s1070_s11] sm:$0xff] (%p920_p6) }
 0x221   : > { %609 = vst [vmem:[%s1070_s11 + $0x18] sm:$0xff] %v601_v18  ;;  %v575_v20 = vpop.f32.mrf.mxu1  ;;  %v641_v24 = vld [vmem:[%s1070_s11 + $0x8] sm:$0xff] (%p920_p6) }
 0x222   : > { %610 = vst [vmem:[%s1070_s11 + $0x20] sm:$0xff] %v561_v19 }
 0x223   : > { %611 = vst [vmem:[%s1070_s11 + $0x28] sm:$0xff] %v575_v20 }
 0x224   : > { %640 = vst [vmem:[%s626_s30] sm:$0xff] (%p920_p6), %v639_v23 }
 0x225   : > { %620 = sbr.rel (!%p920_p6) target bundleno = 562 (0x232), region = 67  ;;  %642 = vst [vmem:[%s626_s30 + $0x8] sm:$0xff] (%p920_p6), %v641_v24 }
 0x227   : > { %v589_v21 = vpop.f32.mrf.mxu2  ;;  %v643_v25 = vld [vmem:[%s1070_s11 + $0x10] sm:$0xff] (%p920_p6) }
 0x228   : > { %612 = vst [vmem:[%s1070_s11 + $0x30] sm:$0xff] %v589_v21  ;;  %v603_v22 = vpop.f32.mrf.mxu3  ;;  %v645_v26 = vld [vmem:[%s1070_s11 + $0x18] sm:$0xff] (%p920_p6) }
 0x229   : > { %613 = vst [vmem:[%s1070_s11 + $0x38] sm:$0xff] %v603_v22  ;;  %v647_v27 = vld [vmem:[%s1070_s11 + $0x20] sm:$0xff] (%p920_p6) }
 0x22a   : > { %644 = vst [vmem:[%s626_s30 + $0x10] sm:$0xff] %v643_v25  ;;  %v649_v28 = vld [vmem:[%s1070_s11 + $0x28] sm:$0xff] }
 0x22b   : > { %646 = vst [vmem:[%s626_s30 + $0x18] sm:$0xff] %v645_v26 }
 0x22c   : > { %648 = vst [vmem:[%s626_s30 + $0x60] sm:$0xff] %v647_v27 }
 0x22d   : > { %650 = vst [vmem:[%s626_s30 + $0x68] sm:$0xff] %v649_v28 }
 0x22f   : > { %v651_v29 = vld [vmem:[%s1070_s11 + $0x30] sm:$0xff] }
 0x230   : > { %v653_v30 = vld [vmem:[%s1070_s11 + $0x38] sm:$0xff]  ;;  %652 = vst [vmem:[%s626_s30 + $0x70] sm:$0xff] %v651_v29 }
 0x231   : > { %654 = vst [vmem:[%s626_s30 + $0x78] sm:$0xff] %v653_v30 }
 0x232 PF: > { %s14_s19 = sadd.s32 1, %s857_s19   ;;  %s1192_s15 = smov %s845_s16 }
 0x233   : > { %p11_p12 = scmp.ge.s32.totalorder %s14_s19, 5   ;;  %s1193_s16 = smov %s925_s25 }
 0x234   : > { %s1194_s17 = smov %s853_s18  ;;  %s1195_s18 = smov %s1197_s20 }
 0x235   :  { %13 = sbr.rel (!%p11_p12) target bundleno = 3 (0x3), region = 124 }

// kernel: attention_forward.4
= control target key start
LH: loop header
LB: loop body
LE: loop exit
PB: predicated region body
PF: predicated region fallthrough
CT: control target
= control target key end

     0   :  { %s1085_s24 = smov 0   ;;  %s1087_s25 = smov 0   ;;  %s1252_s0 = inlined_call_operand.vmem [shape: f32[2,8,1536], index: 0, kind: input, shape index: {}, may-alias: {0,1,2}]   ;;  %s1253_s1 = inlined_call_operand.vmem [shape: f32[2,8,1536], index: 1, kind: input, shape index: {}, may-alias: {0,1,2}]   ;;  %s1254_s2 = inlined_call_operand.vmem [shape: f32[2,8,1536], index: 2, kind: input, shape index: {}, may-alias: {0,1,2}]   ;;  %s1255_s3 = inlined_call_operand.vmem [shape: f32[1,512], index: 3, kind: input, shape index: {}]   ;;  %s1256_s4 = inlined_call_operand.vmem [shape: f32[1,512], index: 4, kind: input, shape index: {}]   ;;  %s1257_s5 = inlined_call_operand.vmem [shape: f32[1,64], index: 5, kind: input, shape index: {}]   ;;  %s1258_s6 = inlined_call_operand.vmem [shape: f32[1,64], index: 6, kind: input, shape index: {}]   ;;  %s1259_s7 = inlined_call_operand.vmem [shape: f32[2,8,512], index: 7, kind: output, shape index: {}]  }
   0x1   :  { %s1089_s26 = smov 0   ;;  %s1091_s27 = smov 0  }
   0x2   :  { %s1093_s28 = smov 0  }
   0x3 LB: > { %s32_s29 = sadd.s32 1, %s1034_s26  ;;  %s36_s30 = sadd.s32 1, %s1038_s27  ;;  %s1042_s28 = sphi %s1093_s28, %s17_s28   ;;  %s1038_s27 = sphi %s1091_s27, %s1263_s27   ;;  %s1034_s26 = sphi %s1089_s26, %s1262_s26   ;;  %s1030_s25 = sphi %s1087_s25, %s1261_s25   ;;  %s1026_s24 = sphi %s1085_s24, %s1260_s24  }
   0x4   : > { %p34_p0 = scmp.ge.s32.totalorder %s32_s29, 4  ;;  %p924_p1 = scmp.ge.s32.totalorder %s1042_s28, 1 }
   0x5   : > { %p325_p2 = scmp.lt.s32.totalorder %s1042_s28, 9 }
   0x6   : > { %s1265_s29 = smov (%p34_p0, %s32_s29), 0  ;;  %s1267_s30 = smov (!%p34_p0, %s36_s30), %s1038_s27 }
   0x7   : > { %p326_p3 = pnand %p924_p1, %p325_p2  ;;  %p38_p4 = scmp.ge.s32.totalorder %s1267_s30, 2 }
   0x8   : > { %p395_p5 = scmp.lt.s32.totalorder (!%p326_p3), %s1030_s25, 1  ;;  %s407_s8 = sadd.s32 (!%p326_p3), 4, %s1026_s24 }
   0x9   : > { %s1269_s30 = smov (%p38_p4, %s1267_s30), 0  ;;  %329 = sbr.rel (%p326_p3) target bundleno = 933 (0x3a5), region = 48 }
   0xa   : > { %p410_p6 = scmp.lt.s32.totalorder (!%p326_p3), %s407_s8, 11  ;;  %p399_p7 = scmp.lt.s32.totalorder (!%p326_p3), %s1026_s24, 11 }
   0xb   : > { %s1044_s17 = smov (!%p326_p3), 64   ;;  %p427_p8 = scmp.lt.s32.totalorder (!%p326_p3), %s1026_s24, 3 }
   0xe   : > { %s1271_s25 = smov (!%p395_p5, %s1030_s25), 1  ;;  %s1273_s8 = smov (!%p410_p6, %s407_s8), 11  ;;  %vm455_vm0 = vcmask 523264   ;;  %v447_v5 = vld [vmem:[%s1257_s5] sm:$0x1]  ;;  %vm476_vm4 = vcmask 519168  }
   0xf   : > { %s1121_s9 = smul.u32 12, %s1271_s25  ;;  %v1150_v6 = vmul.f32 8.0, %v447_v5  ;;  %v978_v12 = vld [vmem:[%s1258_s6] ss:$0 sm:$0xff]  ;;  %vm528_vm8 = vcmask 516096   ;;  %vm502_vm9 = vcmask 1043968  }
  0x10   : > { %s400_s15 = scalar_select %p399_p7, %s1026_s24, 11  ;;  %v1188_v60 = vld [vmem:[%s1258_s6] sm:$0x1] }
  0x11   : > { %s413_s10 = sadd.s32 %s1121_s9, %s1273_s8  ;;  %v523_v7 = vperm.slane %v1150_v6, 0  ;;  %s928_s13 = sshll.u32 %s1271_s25, 2 }
  0x12   : > { %s926_s11 = sshll.u32 %s413_s10, 3  ;;  %s404_s16 = sadd.s32 %s1121_s9, %s400_s15 }
  0x13   : > { %s415_s14 = scalar_lea.vmem %s1253_s1, %s926_s11  ;;  %s925_s18 = sshll.u32 %s404_s16, 3 }
  0x14   : > { %v1128_v0 = vld [vmem:[%s415_s14] sm:$0xff]  ;;  %s406_s21 = scalar_lea.vmem %s1252_s0, %s925_s18  ;;  %s417_s18 = sadd.s32 8, %s1026_s24 }
  0x15   : > { %v454_v1 = vmul.f32 %v1128_v0, %v1128_v0  ;;  %v1139_v3 = vld [vmem:[%s406_s21] sm:$0xff]  ;;  %s1160_s8 = scalar_select %p427_p8, %s1026_s24, 3 }
  0x16   : > { %v1143_v4 = vmul.f32 %v1139_v3, %v1139_v3  ;;  %p420_p9 = scmp.lt.s32.totalorder %s417_s18, 11 }
  0x17   : > { %479 = vrot.lane.b32.xlu0 %v454_v1, %s1044_s17  ;;  %v456_v2 = vsel %vm455_vm0, %v454_v1, 0.0  ;;  %s429_s12 = scalar_lea.vmem %s1255_s3, %s1160_s8  ;;  %s432_s23 = scalar_lea.vmem %s1256_s4, %s1160_s8 }
  0x18   : > { %457 = vadd.xlane.f32.xlu1 %v456_v2  ;;  %v1169_v13 = vld [vmem:[%s429_s12] sm:$0x1]  ;;  %v507_v61 = vsel %vm455_vm0, %v1143_v4, 0.0  ;;  %s1275_s18 = smov (!%p420_p9, %s417_s18), 11  ;;  %s442_s14 = sadd.s32 %s928_s13, %s1160_s8 }
  0x19   : > { %v1174_v14 = vmul.f32 %v1169_v13, %v1169_v13  ;;  %s423_s19 = sadd.s32 %s1121_s9, %s1275_s18  ;;  %s929_s15 = sshll.u32 %s442_s14, 3 }
  0x1a   : > { %s927_s20 = sshll.u32 %s423_s19, 3 }
  0x1b   : > { %v642_v15 = vperm.slane %v1174_v14, 0  ;;  %s425_s24 = scalar_lea.vmem %s1254_s2, %s927_s20 }
  0x1f   : > { %619 = vrot.lane.b32.xlu0 %v1143_v4, %s1044_s17 }
  0x27   : > { %637 = vrot.lane.b32.xlu0 %v523_v7, %s1044_s17 }
  0x89   : > { %v480_v8 = vpop.permute.xlu0 %479 }
  0x8a   : > { %v482_v9 = vsel %vm455_vm0, %v480_v8, 0.0 }
  0x8b   : > { %483 = vadd.xlane.f32.xlu1 %v482_v9  ;;  %v458_v16 = vpop.xlane.xlu1 %457 }
  0x8c   : > { %v459_v17 = vmax.f32 %v458_v16, 1e-24 }
  0x8e   : > { %980 = vrsqrt.f32 %v459_v17  ;;  %vm466_vm1 = vweird.f32 %v459_v17 }
  0x91   : > { %v620_v10 = vpop.permute.xlu0 %619 }
  0x92   : > { %v622_v11 = vsel %vm455_vm0, %v620_v10, 0.0 }
  0x93   : > { %623 = vadd.xlane.f32.xlu2 %v622_v11 }
  0x94   : > { %v981_v18 = vpop.eup %980 }
  0x95   : > { %v461_v19 = vmul.f32 %v981_v18, %v459_v17  ;;  %vm467_vm2 = vweird.f32 %v981_v18 }
  0x96   : > { %vm468_vm3 = vmor %vm466_vm1, %vm467_vm2 }
  0x97   : > { %v462_v20 = vmul.f32 %v981_v18, %v461_v19 }
  0x99   : > { %v463_v21 = vmul.f32 0.5, %v462_v20  ;;  %v638_v52 = vpop.permute.xlu0 %637 }
  0x9b   : > { %v464_v22 = vsub.f32 1.5, %v463_v21 }
  0x9d   : > { %v465_v23 = vmul.f32 %v981_v18, %v464_v22 }
  0x9f   : > { %v469_v24 = vsel %vm468_vm3, %v981_v18, %v465_v23 }
  0xa0   : > { %v470_v25 = vmul.f32 %v469_v24, %v1128_v0 }
  0xa2   : > { %v474_v26 = vmul.f32 %v978_v12, %v470_v25 }
  0xa4   : > { %v475_v27 = vpack.c.bf16 %v474_v26, %v474_v26 }
  0xa6   : > { %477 = vst.msk [vmem:[#allocation2] sm:$0xf] %vm476_vm4, %v475_v27  ;;  %v529_v27 = vsel %vm528_vm8, %v1174_v14, 0.0  ;;  %vm574_vm4 = vcmask 64512  }
  0xab   : > { %497 = vrot.lane.b32.xlu2 %v978_v12, %s1044_s17 }
  0xb3   : > { %643 = vrot.lane.b32.xlu2 %v642_v15, %s1044_s17 }
  0xfe   : > { %v484_v28 = vpop.xlane.xlu1 %483 }
  0xff   : > { %v485_v29 = vmax.f32 %v484_v28, 1e-24 }
 0x101   : > { %982 = vrsqrt.f32 %v485_v29  ;;  %vm492_vm6 = vweird.f32 %v485_v29 }
 0x106   : > { %v624_v30 = vpop.xlane.xlu2 %623 }
 0x107   : > { %v983_v31 = vpop.eup %982  ;;  %v625_v32 = vmax.f32 %v624_v30, 1e-24 }
 0x108   : > { %v487_v33 = vmul.f32 %v983_v31, %v485_v29  ;;  %vm493_vm5 = vweird.f32 %v983_v31 }
 0x109   : > { %984 = vrsqrt.f32 %v625_v32  ;;  %vm494_vm7 = vmor %vm492_vm6, %vm493_vm5  ;;  %vm632_vm11 = vweird.f32 %v625_v32 }
 0x10a   : > { %v488_v34 = vmul.f32 %v983_v31, %v487_v33 }
 0x10c   : > { %v489_v35 = vmul.f32 0.5, %v488_v34 }
 0x10e   : > { %v490_v36 = vsub.f32 1.5, %v489_v35  ;;  %v498_v37 = vpop.permute.xlu2 %497 }
 0x10f   : > { %v985_v38 = vpop.eup %984 }
 0x110   : > { %v627_v39 = vmul.f32 %v985_v38, %v625_v32  ;;  %v491_v40 = vmul.f32 %v983_v31, %v490_v36  ;;  %vm633_vm10 = vweird.f32 %v985_v38 }
 0x111   : > { %vm634_vm12 = vmor %vm632_vm11, %vm633_vm10 }
 0x112   : > { %v628_v41 = vmul.f32 %v985_v38, %v627_v39  ;;  %v495_v42 = vsel %vm494_vm7, %v983_v31, %v491_v40 }
 0x113   : > { %v496_v43 = vmul.f32 %v495_v42, %v1128_v0 }
 0x114   : > { %v629_v44 = vmul.f32 0.5, %v628_v41 }
 0x115   : > { %v500_v45 = vmul.f32 %v498_v37, %v496_v43 }
 0x116   : > { %v630_v46 = vsub.f32 1.5, %v629_v44  ;;  %v644_v47 = vpop.permute.xlu2 %643 }
 0x117   : > { %v501_v48 = vpack.c.bf16 %v500_v45, %v500_v45  ;;  %v646_v49 = vsel %vm528_vm8, %v644_v47, 0.0  ;;  %vm600_vm8 = vcmask 1043456  }
 0x118   : > { %647 = vadd.xlane.f32.xlu2 %v646_v49  ;;  %v631_v50 = vmul.f32 %v985_v38, %v630_v46 }
 0x119   : > { %503 = vst.msk [vmem:[#allocation2] sm:$0xf] %vm502_vm9, %v501_v48 }
 0x11a   : > { %v635_v51 = vsel %vm634_vm12, %v985_v38, %v631_v50 }
 0x11b   : > { %v636_v53 = vmul.f32 %v635_v51, %v1139_v3 }
 0x11d   : > { %v640_v54 = vmul.f32 %v638_v52, %v636_v53 }
 0x11f   : > { %v666_v55 = vpack.c.bf16 %v640_v54, %v640_v54 }
 0x120   : > { %v547_v56 = vld [vmem:[#allocation2] sm:$0xf] }
 0x121   : > { %668 = vrot.lane.b32.xlu0 %v666_v55, %s1044_s17  ;;  %v552_v57 = vsel %vm455_vm0, %v547_v56, 0  ;;  %v671_v58 = vunpack.c.l.b16 %v547_v56 }
 0x122   : > { %561 = vmatpush.bf16.xpose.msra.mxu0 %v552_v57 }
 0x123   : > { %v672_v59 = vpack.c.b16 %v671_v58, %v671_v58 }
 0x125   : > { %673 = vrot.lane.b32.xlu1 %v672_v59, %s1044_s17 }
 0x12d   : > { %662 = vrot.lane.b32.xlu1 %v1188_v60, %s1044_s17 }
 0x14b   : > { %508 = vadd.xlane.f32.xlu0 %v507_v61  ;;  %v979_v61 = vld [vmem:[%s432_s23] ss:$0 sm:$0xff] }
 0x18b   : > { %v648_v62 = vpop.xlane.xlu2 %647 }
 0x18c   : > { %v649_v63 = vmax.f32 %v648_v62, 1e-24 }
 0x18e   : > { %986 = vrsqrt.f32 %v649_v63  ;;  %vm656_vm14 = vweird.f32 %v649_v63 }
 0x193   : > { %v669_v12 = vpop.permute.xlu0 %668 }
 0x194   : > { %v987_v0 = vpop.eup %986 }
 0x195   : > { %v651_v1 = vmul.f32 %v987_v0, %v649_v63  ;;  %vm657_vm13 = vweird.f32 %v987_v0 }
 0x196   : > { %vm658_vm15 = vmor %vm656_vm14, %vm657_vm13 }
 0x197   : > { %v652_v2 = vmul.f32 %v987_v0, %v651_v1  ;;  %v674_v5 = vpop.permute.xlu1 %673 }
 0x198   : > { %v679_v8 = vsel %vm455_vm0, %v674_v5, 0 }
 0x199   : > { %v653_v9 = vmul.f32 0.5, %v652_v2  ;;  %688 = vmatpush.bf16.xpose.msra.mxu2 %v679_v8 }
 0x19b   : > { %v654_v10 = vsub.f32 1.5, %v653_v9 }
 0x19d   : > { %v655_v11 = vmul.f32 %v987_v0, %v654_v10 }
 0x19f   : > { %v663_v15 = vpop.permute.xlu1 %662  ;;  %v659_v4 = vsel %vm658_vm15, %v987_v0, %v655_v11 }
 0x1a0   : > { %932 = vmatmul.msk.bf16.vlgmr.msra.gmra.mxu2 %vm455_vm0, %v669_v12  ;;  %v660_v16 = vmul.f32 %v659_v4, %v1169_v13 }
 0x1a2   : > { %v665_v17 = vmul.f32 %v663_v15, %v660_v16 }
 0x1a4   : > { %v695_v18 = vperm.slane %v665_v17, 0 }
 0x1a6   : > { %v697_v19 = vmul.f32 %v695_v18, %v640_v54 }
 0x1a8   : > { %699 = vrot.lane.b32.xlu1 %v697_v19, %s1044_s17 }
 0x1be   : > { %v509_v20 = vpop.xlane.xlu0 %508 }
 0x1bf   : > { %v510_v21 = vmax.f32 %v509_v20, 1e-24 }
 0x1c1   : > { %988 = vrsqrt.f32 %v510_v21  ;;  %vm517_vm1 = vweird.f32 %v510_v21 }
 0x1c7   : > { %v989_v22 = vpop.eup %988 }
 0x1c8   : > { %v512_v23 = vmul.f32 %v989_v22, %v510_v21  ;;  %vm518_vm2 = vweird.f32 %v989_v22 }
 0x1c9   : > { %vm519_vm3 = vmor %vm517_vm1, %vm518_vm2 }
 0x1ca   : > { %v513_v24 = vmul.f32 %v989_v22, %v512_v23 }
 0x1cc   : > { %v514_v25 = vmul.f32 0.5, %v513_v24 }
 0x1ce   : > { %v515_v26 = vsub.f32 1.5, %v514_v25 }
 0x1d0   : > { %v516_v28 = vmul.f32 %v989_v22, %v515_v26 }
 0x1d2   : > { %v520_v29 = vsel %vm519_vm3, %v989_v22, %v516_v28  ;;  %530 = vadd.xlane.f32.xlu1 %v529_v27 }
 0x1d3   : > { %v521_v30 = vmul.f32 %v520_v29, %v1139_v3  ;;  %v591_v3 = vld [vmem:[%s425_s24] sm:$0xff] }
 0x1d5   : > { %v525_v31 = vmul.f32 %v523_v7, %v521_v30  ;;  %v592_v7 = vpack.c.bf16 %v591_v3, %v591_v3 }
 0x1d7   : > { %v546_v32 = vpack.c.bf16 %v525_v31, %v525_v31  ;;  %v602_v5 = vsel %vm600_vm8, %v592_v7, 0 }
 0x1d8   : > { %611 = vmatpush.bf16.msra.mxu1 %v602_v5 }
 0x1d9   : > { %930 = vmatmul.msk.bf16.vlgmr.msra.gmra.mxu0 %vm455_vm0, %v546_v32 }
 0x21a   : > { %v700_v33 = vpop.permute.xlu1 %699 }
 0x21b   : > { %v702_v34 = vsel %vm455_vm0, %v700_v33, 0.0 }
 0x21c   : > { %703 = vadd.xlane.f32.xlu0 %v702_v34 }
 0x223   : > { %v690_v14 = vpop.f32.mrf.mxu2 }
 0x224   : > { %v705_v35 = vsel %vm574_vm4, %v690_v14, -inf }
 0x225   : > { %706 = vmax.xlane.f32.xlu2 %v705_v35 }
 0x22b   : > { %v692_v6 = vpop.f32.mrf.mxu2 }
 0x230   : > { %723 = vrot.lane.b32.xlu0 %v592_v7, %s1044_s17 }
 0x245   : > { %v531_v36 = vpop.xlane.xlu1 %530 }
 0x246   : > { %v532_v37 = vmax.f32 %v531_v36, 1e-24 }
 0x248   : > { %990 = vrsqrt.f32 %v532_v37  ;;  %vm539_vm5 = vweird.f32 %v532_v37 }
 0x24e   : > { %v991_v38 = vpop.eup %990 }
 0x24f   : > { %v534_v39 = vmul.f32 %v991_v38, %v532_v37  ;;  %vm540_vm6 = vweird.f32 %v991_v38 }
 0x250   : > { %vm541_vm7 = vmor %vm539_vm5, %vm540_vm6 }
 0x251   : > { %v535_v40 = vmul.f32 %v991_v38, %v534_v39 }
 0x253   : > { %v536_v41 = vmul.f32 0.5, %v535_v40 }
 0x255   : > { %v537_v42 = vsub.f32 1.5, %v536_v41 }
 0x256   : > { %v563_v43 = vpop.f32.mrf.mxu0 }
 0x257   : > { %v538_v44 = vmul.f32 %v991_v38, %v537_v42  ;;  %v575_v52 = vsel %vm574_vm4, %v563_v43, -inf }
 0x259   : > { %v542_v45 = vsel %vm541_vm7, %v991_v38, %v538_v44 }
 0x25a   : > { %v543_v46 = vmul.f32 %v542_v45, %v1169_v13 }
 0x25c   : > { %v544_v47 = vmul.f32 %v543_v46, %v1188_v60 }
 0x25e   : > { %v568_v48 = vperm.slane %v544_v47, 0  ;;  %v565_v49 = vpop.f32.mrf.mxu0 }
 0x260   : > { %v570_v50 = vmul.f32 %v568_v48, %v525_v31 }
 0x262   : > { %v571_v51 = vsel %vm455_vm0, %v570_v50, 0.0 }
 0x263   : > { %572 = vadd.xlane.f32.xlu2 %v571_v51 }
 0x26b   : > { %576 = vmax.xlane.f32.xlu2 %v575_v52 }
 0x28f   : > { %v704_v53 = vpop.xlane.xlu0 %703 }
 0x298   : > { %v707_v54 = vpop.xlane.xlu2 %706 }
 0x299   : > { %v708_v55 = vmax.f32 %v707_v54, %v704_v53 }
 0x29b   : > { %v709_v56 = vsub.f32 %v690_v14, %v708_v55  ;;  %v712_v57 = vsub.f32 %v704_v53, %v708_v55 }
 0x29d   : > { %v710_v58 = vmul.f32 1.442695, %v709_v56  ;;  %v713_v59 = vmul.f32 1.442695, %v712_v57 }
 0x29f   : > { %992 = vpow2.f32 %v710_v58 }
 0x2a0   : > { %994 = vpow2.f32 %v713_v59 }
 0x2a2   : > { %v724_v13 = vpop.permute.xlu0 %723 }
 0x2a3   : > { %v733_v60 = vsel %vm600_vm8, %v724_v13, 0 }
 0x2a4   : > { %742 = vmatpush.bf16.msra.mxu3 %v733_v60 }
 0x2a5   : > { %v993_v62 = vpop.eup %992 }
 0x2a6   : > { %v995_v63 = vpop.eup %994  ;;  %v715_v0 = vsel %vm574_vm4, %v993_v62, 0.0  ;;  %v720_v1 = vpack.c.bf16 %v993_v62, %v993_v62 }
 0x2a7   : > { %716 = vadd.xlane.f32.xlu1 %v715_v0  ;;  %v721_v2 = vmul.f32 %v995_v63, %v979_v61 }
 0x2a8   : > { %933 = vmatmul.msk.bf16.vlgmr.msra.gmra.mxu3 %vm574_vm4, %v720_v1 }
 0x2a9   : > { %726 = vrot.lane.b32.xlu0 %v721_v2, %s1044_s17 }
 0x2d6   : > { %v573_v8 = vpop.xlane.xlu2 %572 }
 0x2de   : > { %v577_v9 = vpop.xlane.xlu2 %576 }
 0x2df   : > { %v578_v10 = vmax.f32 %v577_v9, %v573_v8 }
 0x2e1   : > { %v579_v11 = vsub.f32 %v563_v43, %v578_v10  ;;  %v582_v12 = vsub.f32 %v573_v8, %v578_v10 }
 0x2e3   : > { %v580_v15 = vmul.f32 1.442695, %v579_v11  ;;  %v583_v28 = vmul.f32 1.442695, %v582_v12 }
 0x2e5   : > { %996 = vpow2.f32 %v580_v15 }
 0x2eb   : > { %v997_v4 = vpop.eup %996 }
 0x2ec   : > { %v585_v16 = vsel %vm574_vm4, %v997_v4, 0.0  ;;  %v590_v17 = vpack.c.bf16 %v997_v4, %v997_v4 }
 0x2ed   : > { %586 = vadd.xlane.f32.xlu2 %v585_v16 }
 0x2ee   : > { %931 = vmatmul.msk.bf16.vlgmr.msra.gmra.mxu1 %vm574_vm4, %v590_v17 }
 0x31a   : > { %v717_v18 = vpop.xlane.xlu1 %716 }
 0x31b   : > { %v718_v19 = vadd.f32 %v995_v63, %v717_v18  ;;  %v727_v20 = vpop.permute.xlu0 %726 }
 0x31d   : > { %998 = vrcp.f32 %v718_v19 }
 0x31e   : > { %1000 = vpow2.f32 %v583_v28 }
 0x323   : > { %v999_v23 = vpop.eup %998 }
 0x324   : > { %v1001_v30 = vpop.eup %1000 }
 0x325   : > { %v596_v32 = vmul.f32 %v1001_v30, %v979_v61 }
 0x32b   : > { %v744_v21 = vpop.f32.mrf.mxu3 }
 0x32c   : > { %v745_v22 = vadd.f32 %v744_v21, %v727_v20 }
 0x32e   : > { %v748_v24 = vmul.f32 %v999_v23, %v745_v22 }
 0x330   : > { %750 = vrot.lane.b32.xlu1 %v748_v24, %s1044_s17  ;;  %s444_s17 = scalar_lea.vmem %s1259_s7, %s929_s15 }
 0x333   : > { %v746_v25 = vpop.f32.mrf.mxu3 }
 0x360   : > { %v587_v29 = vpop.xlane.xlu2 %586 }
 0x361   : > { %v588_v31 = vadd.f32 %v1001_v30, %v587_v29 }
 0x363   : > { %1002 = vrcp.f32 %v588_v31 }
 0x369   : > { %v1003_v34 = vpop.eup %1002 }
 0x36b   : > { %v613_v26 = vpop.f32.mrf.mxu1 }
 0x36c   : > { %v614_v33 = vadd.f32 %v613_v26, %v596_v32 }
 0x36e   : > { %v617_v14 = vmul.f32 %v1003_v34, %v614_v33 }
 0x373   : > { %v615_v27 = vpop.f32.mrf.mxu1 }
 0x3a2   : > { %v751_v35 = vpop.permute.xlu1 %750 }
 0x3a3   : > { %v753_v3 = vsel %vm455_vm0, %v617_v14, %v751_v35 }
 0x3a4   : > { %754 = vst [vmem:[%s444_s17] sm:$0xff] %v753_v3 }
 0x3a5 PF: > { %s17_s28 = sadd.s32 1, %s1042_s28   ;;  %s1260_s24 = smov %s1034_s26 }
 0x3a6   : > { %p14_p10 = scmp.ge.s32.totalorder %s17_s28, 10   ;;  %s1261_s25 = smov %s1038_s27 }
 0x3a7   : > { %s1262_s26 = smov %s1265_s29  ;;  %s1263_s27 = smov %s1269_s30 }
 0x3a8   :  { %16 = sbr.rel (!%p14_p10) target bundleno = 3 (0x3), region = 94 }

</bundles_post_ra>
